<compile_context>
chip_gen: v7x
topology: tpu7x:2x2x1
jax: 0.10.0
libtpu: 0.0.40
codegen_flags: <defaults>
</compile_context>

<pallas_src>
import jax
import jax.numpy as jnp
from jax.experimental import pallas as pl
from jax.experimental.pallas import tpu as pltpu

_EPS = 1e-5


def _round_up(x, m):
    return (x + m - 1) // m * m


def _aux_head_kernel(x_ref, w1_ref, b1_ref, w2_ref, b2_ref, wl_ref, bl_ref,
                     out_ref):
    # x_ref : (64, NT, Cpad) bf16  -- spatial index h*8+w leading, channels on lanes
    # w1    : (Cpad, 128) bf16  (BN1 scale and 1/25 folded)   b1 : (1, 128) f32
    # w2    : (512, 768)  bf16  (BN2 scale folded)            b2 : (1, 768) f32
    # wl    : (768, CLSp) bf16                                bl : (1, CLSp) f32
    # out   : (NT, CLSp)  f32
    nt = x_ref.shape[1]

    def relu_row(h, w):
        return jnp.maximum(x_ref[h * 8 + w].astype(jnp.float32), 0.0)

    # ReLU + AvgPool2d(5, stride=3, pad=0) on the 8x8 map -> 2x2 positions,
    # with shared partial sums (rows 3,4 and cols 3,4 overlap both windows).
    top, bot = [], []
    for w in range(8):
        mid = relu_row(3, w) + relu_row(4, w)
        top.append(mid + relu_row(0, w) + relu_row(1, w) + relu_row(2, w))
        bot.append(mid + relu_row(5, w) + relu_row(6, w) + relu_row(7, w))

    def hsplit(cols):
        midc = cols[3] + cols[4]
        left = midc + cols[0] + cols[1] + cols[2]
        right = midc + cols[5] + cols[6] + cols[7]
        return left, right

    p00, p01 = hsplit(top)
    p10, p11 = hsplit(bot)
    pooled = (p00, p01, p10, p11)          # position p = kh*2 + kw

    # conv1 (1x1, C->128; BN1 scale + 1/25 folded into w1) + bias + ReLU, then
    # conv2 (2x2, 128->768; BN2 scale folded into w2) as four accumulating
    # K=128 matmuls whose K offset matches the kernel position p.
    acc = jnp.zeros((nt, 768), jnp.float32)
    for p in range(4):
        h1 = jnp.dot(pooled[p].astype(jnp.bfloat16), w1_ref[...],
                     preferred_element_type=jnp.float32)          # (NT, 128)
        h1 = jnp.maximum(h1 + b1_ref[...], 0.0).astype(jnp.bfloat16)
        acc = acc + jnp.dot(h1, w2_ref[p * 128:(p + 1) * 128, :],
                            preferred_element_type=jnp.float32)   # (NT, 768)

    # Folded BN2 bias + ReLU; AdaptiveAvgPool2d(1) on the 1x1 map is identity.
    h2 = jnp.maximum(acc + b2_ref[...], 0.0)

    # Linear classifier (classes zero-padded to a lane-dense 128 multiple).
    out_ref[...] = (jnp.dot(h2.astype(jnp.bfloat16), wl_ref[...],
                            preferred_element_type=jnp.float32) + bl_ref[...])


def aux_head_forward(x, params):
    n, c = x.shape[0], x.shape[1]
    c_pad = params["w1"].shape[0]
    cls_pad = params["wl"].shape[1]
    num_classes = params["num_classes"]

    # NCHW -> (H*W, N, C): spatial index leading so each spatial row is a
    # contiguous lane-dense slab; pad batch/channels; bf16 to halve HBM bytes.
    xr = jnp.transpose(x, (2, 3, 0, 1)).reshape(64, n, c)
    n_tile = 128 if n >= 128 else _round_up(n, 8)
    n_pad = _round_up(n, n_tile)
    xr = jnp.pad(xr, ((0, 0), (0, n_pad - n), (0, c_pad - c)))
    xr = xr.astype(jnp.bfloat16)

    def resident(arr):
        # Full-array block, same block every grid step -> stays VMEM-resident.
        nd = arr.ndim
        return pl.BlockSpec(arr.shape, lambda i, _nd=nd: (0,) * _nd)

    out = pl.pallas_call(
        _aux_head_kernel,
        out_shape=jax.ShapeDtypeStruct((n_pad, cls_pad), jnp.float32),
        grid=(n_pad // n_tile,),
        in_specs=[
            pl.BlockSpec((64, n_tile, c_pad), lambda i: (0, i, 0)),
            resident(params["w1"]),
            resident(params["b1"]),
            resident(params["w2"]),
            resident(params["b2"]),
            resident(params["wl"]),
            resident(params["bl"]),
        ],
        out_specs=pl.BlockSpec((n_tile, cls_pad), lambda i: (i, 0)),
        compiler_params=pltpu.CompilerParams(
            dimension_semantics=("parallel",)),
    )(xr, params["w1"], params["b1"], params["w2"], params["b2"],
      params["wl"], params["bl"])
    return out[:n, :num_classes]


def init_raw_params(key, c, num_classes):
    """Deterministic synthetic parameters with the shapes from __init__."""
    ks = jax.random.split(key, 14)
    raw = {
        "conv1": jax.random.normal(ks[0], (128, c, 1, 1), jnp.float32) * 0.1,
        "gamma1": jax.random.uniform(ks[1], (128,), jnp.float32, 0.5, 1.5),
        "beta1": jax.random.normal(ks[2], (128,), jnp.float32) * 0.1,
        "mean1": jax.random.normal(ks[3], (128,), jnp.float32) * 0.1,
        "var1": jax.random.uniform(ks[4], (128,), jnp.float32, 0.5, 1.5),
        "conv2": jax.random.normal(ks[5], (768, 128, 2, 2), jnp.float32) * 0.05,
        "gamma2": jax.random.uniform(ks[6], (768,), jnp.float32, 0.5, 1.5),
        "beta2": jax.random.normal(ks[7], (768,), jnp.float32) * 0.1,
        "mean2": jax.random.normal(ks[8], (768,), jnp.float32) * 0.1,
        "var2": jax.random.uniform(ks[9], (768,), jnp.float32, 0.5, 1.5),
        "wl": jax.random.normal(ks[10], (num_classes, 768), jnp.float32) * 0.05,
        "bl": jax.random.normal(ks[11], (num_classes,), jnp.float32) * 0.1,
    }
    return raw


def fold_params(raw, num_classes):
    """Fold BN (eval mode) + 1/25 into conv weights, pad, cast MXU operands."""
    c = raw["conv1"].shape[1]
    c_pad = _round_up(c, 128)
    cls_pad = _round_up(num_classes, 128)

    s1 = raw["gamma1"] / jnp.sqrt(raw["var1"] + _EPS)
    b1 = raw["beta1"] - raw["mean1"] * s1
    s2 = raw["gamma2"] / jnp.sqrt(raw["var2"] + _EPS)
    b2 = raw["beta2"] - raw["mean2"] * s2

    # conv1 (128, C, 1, 1) -> (C, 128); fold BN1 scale and the avg-pool 1/25.
    w1 = raw["conv1"].reshape(128, c).T * s1[None, :] * (1.0 / 25.0)
    w1 = jnp.pad(w1, ((0, c_pad - c), (0, 0)))                    # (Cpad, 128)
    # conv2 (O,I,kh,kw) -> (kh,kw,I,O) -> (512, 768); fold BN2 scale.
    # K index = (kh*2 + kw)*128 + I, matching the kernel's position loop.
    w2 = (jnp.transpose(raw["conv2"], (2, 3, 1, 0)).reshape(512, 768)
          * s2[None, :])
    wl = jnp.pad(raw["wl"].T, ((0, 0), (0, cls_pad - num_classes)))
    bl = jnp.pad(raw["bl"], ((0, cls_pad - num_classes),))

    return {
        "w1": w1.astype(jnp.bfloat16),
        "b1": b1.reshape(1, 128).astype(jnp.float32),
        "w2": w2.astype(jnp.bfloat16),
        "b2": b2.reshape(1, 768).astype(jnp.float32),
        "wl": wl.astype(jnp.bfloat16),
        "bl": bl.reshape(1, cls_pad).astype(jnp.float32),
        "num_classes": num_classes,
    }


def reference_forward(x, raw):
    """Pure-JAX f32 reference matching PyTorch eval-mode semantics."""
    dn = ("NCHW", "OIHW", "NCHW")
    h = jnp.maximum(x, 0.0)
    h = jax.lax.reduce_window(h, 0.0, jax.lax.add,
                              (1, 1, 5, 5), (1, 1, 3, 3), "VALID") / 25.0
    h = jax.lax.conv_general_dilated(h, raw["conv1"], (1, 1), "VALID",
                                     dimension_numbers=dn)
    h = ((h - raw["mean1"][None, :, None, None])
         / jnp.sqrt(raw["var1"][None, :, None, None] + _EPS)
         * raw["gamma1"][None, :, None, None]
         + raw["beta1"][None, :, None, None])
    h = jnp.maximum(h, 0.0)
    h = jax.lax.conv_general_dilated(h, raw["conv2"], (1, 1), "VALID",
                                     dimension_numbers=dn)
    h = ((h - raw["mean2"][None, :, None, None])
         / jnp.sqrt(raw["var2"][None, :, None, None] + _EPS)
         * raw["gamma2"][None, :, None, None]
         + raw["beta2"][None, :, None, None])
    h = jnp.maximum(h, 0.0)
    h = jnp.mean(h, axis=(2, 3))                                   # (N, 768)
    return h @ raw["wl"].T + raw["bl"]


if __name__ == "__main__":
    N, C, H, W = 2, 4, 8, 8          # module assumes 8x8 spatial input
    NUM_CLASSES = 10

    key = jax.random.PRNGKey(0)
    kx, kp = jax.random.split(key)
    x = jax.random.normal(kx, (N, C, H, W), jnp.float32)

    raw = init_raw_params(kp, C, NUM_CLASSES)
    params = fold_params(raw, NUM_CLASSES)

    out = jax.block_until_ready(aux_head_forward(x, params))
    ref = reference_forward(x, raw)

    assert out.shape == (N, NUM_CLASSES)
    # Tolerance sized for bf16 MXU operands (accumulation and bias math are f32).
    assert jnp.allclose(out, ref, rtol=2e-2, atol=2e-2), (out, ref)

    print("KERNEL_OK")
</pallas_src>

<mosaic_0001>
module attributes {stable_mosaic.version = 11 : i64} {
  func.func @_aux_head_kernel(%arg0: i32, %arg1: memref<64x8x128xbf16, #tpu.memory_space<vmem>>, %arg2: memref<128x128xbf16, #tpu.memory_space<vmem>>, %arg3: memref<1x128xf32, #tpu.memory_space<vmem>>, %arg4: memref<512x768xbf16, #tpu.memory_space<vmem>>, %arg5: memref<1x768xf32, #tpu.memory_space<vmem>>, %arg6: memref<768x128xbf16, #tpu.memory_space<vmem>>, %arg7: memref<1x128xf32, #tpu.memory_space<vmem>>, %arg8: memref<8x128xf32, #tpu.memory_space<vmem>>) attributes {dimension_semantics = [#tpu.dimension_semantics<parallel>], iteration_bounds = array<i64: 1>, scalar_prefetch = 0 : i64, scratch_operands = 0 : i64, tpu.core_type = #tpu.core_type<tc>, window_params = [{transform_indices = @transform_0, window_bounds = array<i64: 64, 8, 128>}, {pipeline_mode = #tpu.pipeline_mode<synchronous>, transform_indices = @transform_1, window_bounds = array<i64: 128, 128>}, {pipeline_mode = #tpu.pipeline_mode<synchronous>, transform_indices = @transform_2, window_bounds = array<i64: 1, 128>}, {pipeline_mode = #tpu.pipeline_mode<synchronous>, transform_indices = @transform_3, window_bounds = array<i64: 512, 768>}, {pipeline_mode = #tpu.pipeline_mode<synchronous>, transform_indices = @transform_4, window_bounds = array<i64: 1, 768>}, {pipeline_mode = #tpu.pipeline_mode<synchronous>, transform_indices = @transform_5, window_bounds = array<i64: 768, 128>}, {pipeline_mode = #tpu.pipeline_mode<synchronous>, transform_indices = @transform_6, window_bounds = array<i64: 1, 128>}, {transform_indices = @transform_7, window_bounds = array<i64: 8, 128>}]} {
    %c24 = arith.constant 24 : index
    %c0 = arith.constant 0 : index
    %c0_0 = arith.constant 0 : index
    %0 = vector.load %arg1[%c24, %c0, %c0_0] : memref<64x8x128xbf16, #tpu.memory_space<vmem>>, vector<1x8x128xbf16>
    %1 = vector.shape_cast %0 : vector<1x8x128xbf16> to vector<8x128xbf16>
    %2 = arith.extf %1 : vector<8x128xbf16> to vector<8x128xf32>
    %cst = arith.constant 0.000000e+00 : f32
    %3 = vector.broadcast %cst : f32 to vector<8x128xf32>
    %4 = arith.maximumf %2, %3 : vector<8x128xf32>
    %c32 = arith.constant 32 : index
    %c0_1 = arith.constant 0 : index
    %c0_2 = arith.constant 0 : index
    %5 = vector.load %arg1[%c32, %c0_1, %c0_2] : memref<64x8x128xbf16, #tpu.memory_space<vmem>>, vector<1x8x128xbf16>
    %6 = vector.shape_cast %5 : vector<1x8x128xbf16> to vector<8x128xbf16>
    %7 = arith.extf %6 : vector<8x128xbf16> to vector<8x128xf32>
    %cst_3 = arith.constant 0.000000e+00 : f32
    %8 = vector.broadcast %cst_3 : f32 to vector<8x128xf32>
    %9 = arith.maximumf %7, %8 : vector<8x128xf32>
    %10 = arith.addf %4, %9 : vector<8x128xf32>
    %c0_4 = arith.constant 0 : index
    %c0_5 = arith.constant 0 : index
    %c0_6 = arith.constant 0 : index
    %11 = vector.load %arg1[%c0_4, %c0_5, %c0_6] : memref<64x8x128xbf16, #tpu.memory_space<vmem>>, vector<1x8x128xbf16>
    %12 = vector.shape_cast %11 : vector<1x8x128xbf16> to vector<8x128xbf16>
    %13 = arith.extf %12 : vector<8x128xbf16> to vector<8x128xf32>
    %cst_7 = arith.constant 0.000000e+00 : f32
    %14 = vector.broadcast %cst_7 : f32 to vector<8x128xf32>
    %15 = arith.maximumf %13, %14 : vector<8x128xf32>
    %16 = arith.addf %10, %15 : vector<8x128xf32>
    %c8 = arith.constant 8 : index
    %c0_8 = arith.constant 0 : index
    %c0_9 = arith.constant 0 : index
    %17 = vector.load %arg1[%c8, %c0_8, %c0_9] : memref<64x8x128xbf16, #tpu.memory_space<vmem>>, vector<1x8x128xbf16>
    %18 = vector.shape_cast %17 : vector<1x8x128xbf16> to vector<8x128xbf16>
    %19 = arith.extf %18 : vector<8x128xbf16> to vector<8x128xf32>
    %cst_10 = arith.constant 0.000000e+00 : f32
    %20 = vector.broadcast %cst_10 : f32 to vector<8x128xf32>
    %21 = arith.maximumf %19, %20 : vector<8x128xf32>
    %22 = arith.addf %16, %21 : vector<8x128xf32>
    %c16 = arith.constant 16 : index
    %c0_11 = arith.constant 0 : index
    %c0_12 = arith.constant 0 : index
    %23 = vector.load %arg1[%c16, %c0_11, %c0_12] : memref<64x8x128xbf16, #tpu.memory_space<vmem>>, vector<1x8x128xbf16>
    %24 = vector.shape_cast %23 : vector<1x8x128xbf16> to vector<8x128xbf16>
    %25 = arith.extf %24 : vector<8x128xbf16> to vector<8x128xf32>
    %cst_13 = arith.constant 0.000000e+00 : f32
    %26 = vector.broadcast %cst_13 : f32 to vector<8x128xf32>
    %27 = arith.maximumf %25, %26 : vector<8x128xf32>
    %28 = arith.addf %22, %27 : vector<8x128xf32>
    %c40 = arith.constant 40 : index
    %c0_14 = arith.constant 0 : index
    %c0_15 = arith.constant 0 : index
    %29 = vector.load %arg1[%c40, %c0_14, %c0_15] : memref<64x8x128xbf16, #tpu.memory_space<vmem>>, vector<1x8x128xbf16>
    %30 = vector.shape_cast %29 : vector<1x8x128xbf16> to vector<8x128xbf16>
    %31 = arith.extf %30 : vector<8x128xbf16> to vector<8x128xf32>
    %cst_16 = arith.constant 0.000000e+00 : f32
    %32 = vector.broadcast %cst_16 : f32 to vector<8x128xf32>
    %33 = arith.maximumf %31, %32 : vector<8x128xf32>
    %34 = arith.addf %10, %33 : vector<8x128xf32>
    %c48 = arith.constant 48 : index
    %c0_17 = arith.constant 0 : index
    %c0_18 = arith.constant 0 : index
    %35 = vector.load %arg1[%c48, %c0_17, %c0_18] : memref<64x8x128xbf16, #tpu.memory_space<vmem>>, vector<1x8x128xbf16>
    %36 = vector.shape_cast %35 : vector<1x8x128xbf16> to vector<8x128xbf16>
    %37 = arith.extf %36 : vector<8x128xbf16> to vector<8x128xf32>
    %cst_19 = arith.constant 0.000000e+00 : f32
    %38 = vector.broadcast %cst_19 : f32 to vector<8x128xf32>
    %39 = arith.maximumf %37, %38 : vector<8x128xf32>
    %40 = arith.addf %34, %39 : vector<8x128xf32>
    %c56 = arith.constant 56 : index
    %c0_20 = arith.constant 0 : index
    %c0_21 = arith.constant 0 : index
    %41 = vector.load %arg1[%c56, %c0_20, %c0_21] : memref<64x8x128xbf16, #tpu.memory_space<vmem>>, vector<1x8x128xbf16>
    %42 = vector.shape_cast %41 : vector<1x8x128xbf16> to vector<8x128xbf16>
    %43 = arith.extf %42 : vector<8x128xbf16> to vector<8x128xf32>
    %cst_22 = arith.constant 0.000000e+00 : f32
    %44 = vector.broadcast %cst_22 : f32 to vector<8x128xf32>
    %45 = arith.maximumf %43, %44 : vector<8x128xf32>
    %46 = arith.addf %40, %45 : vector<8x128xf32>
    %c25 = arith.constant 25 : index
    %c0_23 = arith.constant 0 : index
    %c0_24 = arith.constant 0 : index
    %47 = vector.load %arg1[%c25, %c0_23, %c0_24] : memref<64x8x128xbf16, #tpu.memory_space<vmem>>, vector<1x8x128xbf16>
    %48 = vector.shape_cast %47 : vector<1x8x128xbf16> to vector<8x128xbf16>
    %49 = arith.extf %48 : vector<8x128xbf16> to vector<8x128xf32>
    %cst_25 = arith.constant 0.000000e+00 : f32
    %50 = vector.broadcast %cst_25 : f32 to vector<8x128xf32>
    %51 = arith.maximumf %49, %50 : vector<8x128xf32>
    %c33 = arith.constant 33 : index
    %c0_26 = arith.constant 0 : index
    %c0_27 = arith.constant 0 : index
    %52 = vector.load %arg1[%c33, %c0_26, %c0_27] : memref<64x8x128xbf16, #tpu.memory_space<vmem>>, vector<1x8x128xbf16>
    %53 = vector.shape_cast %52 : vector<1x8x128xbf16> to vector<8x128xbf16>
    %54 = arith.extf %53 : vector<8x128xbf16> to vector<8x128xf32>
    %cst_28 = arith.constant 0.000000e+00 : f32
    %55 = vector.broadcast %cst_28 : f32 to vector<8x128xf32>
    %56 = arith.maximumf %54, %55 : vector<8x128xf32>
    %57 = arith.addf %51, %56 : vector<8x128xf32>
    %c1 = arith.constant 1 : index
    %c0_29 = arith.constant 0 : index
    %c0_30 = arith.constant 0 : index
    %58 = vector.load %arg1[%c1, %c0_29, %c0_30] : memref<64x8x128xbf16, #tpu.memory_space<vmem>>, vector<1x8x128xbf16>
    %59 = vector.shape_cast %58 : vector<1x8x128xbf16> to vector<8x128xbf16>
    %60 = arith.extf %59 : vector<8x128xbf16> to vector<8x128xf32>
    %cst_31 = arith.constant 0.000000e+00 : f32
    %61 = vector.broadcast %cst_31 : f32 to vector<8x128xf32>
    %62 = arith.maximumf %60, %61 : vector<8x128xf32>
    %63 = arith.addf %57, %62 : vector<8x128xf32>
    %c9 = arith.constant 9 : index
    %c0_32 = arith.constant 0 : index
    %c0_33 = arith.constant 0 : index
    %64 = vector.load %arg1[%c9, %c0_32, %c0_33] : memref<64x8x128xbf16, #tpu.memory_space<vmem>>, vector<1x8x128xbf16>
    %65 = vector.shape_cast %64 : vector<1x8x128xbf16> to vector<8x128xbf16>
    %66 = arith.extf %65 : vector<8x128xbf16> to vector<8x128xf32>
    %cst_34 = arith.constant 0.000000e+00 : f32
    %67 = vector.broadcast %cst_34 : f32 to vector<8x128xf32>
    %68 = arith.maximumf %66, %67 : vector<8x128xf32>
    %69 = arith.addf %63, %68 : vector<8x128xf32>
    %c17 = arith.constant 17 : index
    %c0_35 = arith.constant 0 : index
    %c0_36 = arith.constant 0 : index
    %70 = vector.load %arg1[%c17, %c0_35, %c0_36] : memref<64x8x128xbf16, #tpu.memory_space<vmem>>, vector<1x8x128xbf16>
    %71 = vector.shape_cast %70 : vector<1x8x128xbf16> to vector<8x128xbf16>
    %72 = arith.extf %71 : vector<8x128xbf16> to vector<8x128xf32>
    %cst_37 = arith.constant 0.000000e+00 : f32
    %73 = vector.broadcast %cst_37 : f32 to vector<8x128xf32>
    %74 = arith.maximumf %72, %73 : vector<8x128xf32>
    %75 = arith.addf %69, %74 : vector<8x128xf32>
    %c41 = arith.constant 41 : index
    %c0_38 = arith.constant 0 : index
    %c0_39 = arith.constant 0 : index
    %76 = vector.load %arg1[%c41, %c0_38, %c0_39] : memref<64x8x128xbf16, #tpu.memory_space<vmem>>, vector<1x8x128xbf16>
    %77 = vector.shape_cast %76 : vector<1x8x128xbf16> to vector<8x128xbf16>
    %78 = arith.extf %77 : vector<8x128xbf16> to vector<8x128xf32>
    %cst_40 = arith.constant 0.000000e+00 : f32
    %79 = vector.broadcast %cst_40 : f32 to vector<8x128xf32>
    %80 = arith.maximumf %78, %79 : vector<8x128xf32>
    %81 = arith.addf %57, %80 : vector<8x128xf32>
    %c49 = arith.constant 49 : index
    %c0_41 = arith.constant 0 : index
    %c0_42 = arith.constant 0 : index
    %82 = vector.load %arg1[%c49, %c0_41, %c0_42] : memref<64x8x128xbf16, #tpu.memory_space<vmem>>, vector<1x8x128xbf16>
    %83 = vector.shape_cast %82 : vector<1x8x128xbf16> to vector<8x128xbf16>
    %84 = arith.extf %83 : vector<8x128xbf16> to vector<8x128xf32>
    %cst_43 = arith.constant 0.000000e+00 : f32
    %85 = vector.broadcast %cst_43 : f32 to vector<8x128xf32>
    %86 = arith.maximumf %84, %85 : vector<8x128xf32>
    %87 = arith.addf %81, %86 : vector<8x128xf32>
    %c57 = arith.constant 57 : index
    %c0_44 = arith.constant 0 : index
    %c0_45 = arith.constant 0 : index
    %88 = vector.load %arg1[%c57, %c0_44, %c0_45] : memref<64x8x128xbf16, #tpu.memory_space<vmem>>, vector<1x8x128xbf16>
    %89 = vector.shape_cast %88 : vector<1x8x128xbf16> to vector<8x128xbf16>
    %90 = arith.extf %89 : vector<8x128xbf16> to vector<8x128xf32>
    %cst_46 = arith.constant 0.000000e+00 : f32
    %91 = vector.broadcast %cst_46 : f32 to vector<8x128xf32>
    %92 = arith.maximumf %90, %91 : vector<8x128xf32>
    %93 = arith.addf %87, %92 : vector<8x128xf32>
    %c26 = arith.constant 26 : index
    %c0_47 = arith.constant 0 : index
    %c0_48 = arith.constant 0 : index
    %94 = vector.load %arg1[%c26, %c0_47, %c0_48] : memref<64x8x128xbf16, #tpu.memory_space<vmem>>, vector<1x8x128xbf16>
    %95 = vector.shape_cast %94 : vector<1x8x128xbf16> to vector<8x128xbf16>
    %96 = arith.extf %95 : vector<8x128xbf16> to vector<8x128xf32>
    %cst_49 = arith.constant 0.000000e+00 : f32
    %97 = vector.broadcast %cst_49 : f32 to vector<8x128xf32>
    %98 = arith.maximumf %96, %97 : vector<8x128xf32>
    %c34 = arith.constant 34 : index
    %c0_50 = arith.constant 0 : index
    %c0_51 = arith.constant 0 : index
    %99 = vector.load %arg1[%c34, %c0_50, %c0_51] : memref<64x8x128xbf16, #tpu.memory_space<vmem>>, vector<1x8x128xbf16>
    %100 = vector.shape_cast %99 : vector<1x8x128xbf16> to vector<8x128xbf16>
    %101 = arith.extf %100 : vector<8x128xbf16> to vector<8x128xf32>
    %cst_52 = arith.constant 0.000000e+00 : f32
    %102 = vector.broadcast %cst_52 : f32 to vector<8x128xf32>
    %103 = arith.maximumf %101, %102 : vector<8x128xf32>
    %104 = arith.addf %98, %103 : vector<8x128xf32>
    %c2 = arith.constant 2 : index
    %c0_53 = arith.constant 0 : index
    %c0_54 = arith.constant 0 : index
    %105 = vector.load %arg1[%c2, %c0_53, %c0_54] : memref<64x8x128xbf16, #tpu.memory_space<vmem>>, vector<1x8x128xbf16>
    %106 = vector.shape_cast %105 : vector<1x8x128xbf16> to vector<8x128xbf16>
    %107 = arith.extf %106 : vector<8x128xbf16> to vector<8x128xf32>
    %cst_55 = arith.constant 0.000000e+00 : f32
    %108 = vector.broadcast %cst_55 : f32 to vector<8x128xf32>
    %109 = arith.maximumf %107, %108 : vector<8x128xf32>
    %110 = arith.addf %104, %109 : vector<8x128xf32>
    %c10 = arith.constant 10 : index
    %c0_56 = arith.constant 0 : index
    %c0_57 = arith.constant 0 : index
    %111 = vector.load %arg1[%c10, %c0_56, %c0_57] : memref<64x8x128xbf16, #tpu.memory_space<vmem>>, vector<1x8x128xbf16>
    %112 = vector.shape_cast %111 : vector<1x8x128xbf16> to vector<8x128xbf16>
    %113 = arith.extf %112 : vector<8x128xbf16> to vector<8x128xf32>
    %cst_58 = arith.constant 0.000000e+00 : f32
    %114 = vector.broadcast %cst_58 : f32 to vector<8x128xf32>
    %115 = arith.maximumf %113, %114 : vector<8x128xf32>
    %116 = arith.addf %110, %115 : vector<8x128xf32>
    %c18 = arith.constant 18 : index
    %c0_59 = arith.constant 0 : index
    %c0_60 = arith.constant 0 : index
    %117 = vector.load %arg1[%c18, %c0_59, %c0_60] : memref<64x8x128xbf16, #tpu.memory_space<vmem>>, vector<1x8x128xbf16>
    %118 = vector.shape_cast %117 : vector<1x8x128xbf16> to vector<8x128xbf16>
    %119 = arith.extf %118 : vector<8x128xbf16> to vector<8x128xf32>
    %cst_61 = arith.constant 0.000000e+00 : f32
    %120 = vector.broadcast %cst_61 : f32 to vector<8x128xf32>
    %121 = arith.maximumf %119, %120 : vector<8x128xf32>
    %122 = arith.addf %116, %121 : vector<8x128xf32>
    %c42 = arith.constant 42 : index
    %c0_62 = arith.constant 0 : index
    %c0_63 = arith.constant 0 : index
    %123 = vector.load %arg1[%c42, %c0_62, %c0_63] : memref<64x8x128xbf16, #tpu.memory_space<vmem>>, vector<1x8x128xbf16>
    %124 = vector.shape_cast %123 : vector<1x8x128xbf16> to vector<8x128xbf16>
    %125 = arith.extf %124 : vector<8x128xbf16> to vector<8x128xf32>
    %cst_64 = arith.constant 0.000000e+00 : f32
    %126 = vector.broadcast %cst_64 : f32 to vector<8x128xf32>
    %127 = arith.maximumf %125, %126 : vector<8x128xf32>
    %128 = arith.addf %104, %127 : vector<8x128xf32>
    %c50 = arith.constant 50 : index
    %c0_65 = arith.constant 0 : index
    %c0_66 = arith.constant 0 : index
    %129 = vector.load %arg1[%c50, %c0_65, %c0_66] : memref<64x8x128xbf16, #tpu.memory_space<vmem>>, vector<1x8x128xbf16>
    %130 = vector.shape_cast %129 : vector<1x8x128xbf16> to vector<8x128xbf16>
    %131 = arith.extf %130 : vector<8x128xbf16> to vector<8x128xf32>
    %cst_67 = arith.constant 0.000000e+00 : f32
    %132 = vector.broadcast %cst_67 : f32 to vector<8x128xf32>
    %133 = arith.maximumf %131, %132 : vector<8x128xf32>
    %134 = arith.addf %128, %133 : vector<8x128xf32>
    %c58 = arith.constant 58 : index
    %c0_68 = arith.constant 0 : index
    %c0_69 = arith.constant 0 : index
    %135 = vector.load %arg1[%c58, %c0_68, %c0_69] : memref<64x8x128xbf16, #tpu.memory_space<vmem>>, vector<1x8x128xbf16>
    %136 = vector.shape_cast %135 : vector<1x8x128xbf16> to vector<8x128xbf16>
    %137 = arith.extf %136 : vector<8x128xbf16> to vector<8x128xf32>
    %cst_70 = arith.constant 0.000000e+00 : f32
    %138 = vector.broadcast %cst_70 : f32 to vector<8x128xf32>
    %139 = arith.maximumf %137, %138 : vector<8x128xf32>
    %140 = arith.addf %134, %139 : vector<8x128xf32>
    %c27 = arith.constant 27 : index
    %c0_71 = arith.constant 0 : index
    %c0_72 = arith.constant 0 : index
    %141 = vector.load %arg1[%c27, %c0_71, %c0_72] : memref<64x8x128xbf16, #tpu.memory_space<vmem>>, vector<1x8x128xbf16>
    %142 = vector.shape_cast %141 : vector<1x8x128xbf16> to vector<8x128xbf16>
    %143 = arith.extf %142 : vector<8x128xbf16> to vector<8x128xf32>
    %cst_73 = arith.constant 0.000000e+00 : f32
    %144 = vector.broadcast %cst_73 : f32 to vector<8x128xf32>
    %145 = arith.maximumf %143, %144 : vector<8x128xf32>
    %c35 = arith.constant 35 : index
    %c0_74 = arith.constant 0 : index
    %c0_75 = arith.constant 0 : index
    %146 = vector.load %arg1[%c35, %c0_74, %c0_75] : memref<64x8x128xbf16, #tpu.memory_space<vmem>>, vector<1x8x128xbf16>
    %147 = vector.shape_cast %146 : vector<1x8x128xbf16> to vector<8x128xbf16>
    %148 = arith.extf %147 : vector<8x128xbf16> to vector<8x128xf32>
    %cst_76 = arith.constant 0.000000e+00 : f32
    %149 = vector.broadcast %cst_76 : f32 to vector<8x128xf32>
    %150 = arith.maximumf %148, %149 : vector<8x128xf32>
    %151 = arith.addf %145, %150 : vector<8x128xf32>
    %c3 = arith.constant 3 : index
    %c0_77 = arith.constant 0 : index
    %c0_78 = arith.constant 0 : index
    %152 = vector.load %arg1[%c3, %c0_77, %c0_78] : memref<64x8x128xbf16, #tpu.memory_space<vmem>>, vector<1x8x128xbf16>
    %153 = vector.shape_cast %152 : vector<1x8x128xbf16> to vector<8x128xbf16>
    %154 = arith.extf %153 : vector<8x128xbf16> to vector<8x128xf32>
    %cst_79 = arith.constant 0.000000e+00 : f32
    %155 = vector.broadcast %cst_79 : f32 to vector<8x128xf32>
    %156 = arith.maximumf %154, %155 : vector<8x128xf32>
    %157 = arith.addf %151, %156 : vector<8x128xf32>
    %c11 = arith.constant 11 : index
    %c0_80 = arith.constant 0 : index
    %c0_81 = arith.constant 0 : index
    %158 = vector.load %arg1[%c11, %c0_80, %c0_81] : memref<64x8x128xbf16, #tpu.memory_space<vmem>>, vector<1x8x128xbf16>
    %159 = vector.shape_cast %158 : vector<1x8x128xbf16> to vector<8x128xbf16>
    %160 = arith.extf %159 : vector<8x128xbf16> to vector<8x128xf32>
    %cst_82 = arith.constant 0.000000e+00 : f32
    %161 = vector.broadcast %cst_82 : f32 to vector<8x128xf32>
    %162 = arith.maximumf %160, %161 : vector<8x128xf32>
    %163 = arith.addf %157, %162 : vector<8x128xf32>
    %c19 = arith.constant 19 : index
    %c0_83 = arith.constant 0 : index
    %c0_84 = arith.constant 0 : index
    %164 = vector.load %arg1[%c19, %c0_83, %c0_84] : memref<64x8x128xbf16, #tpu.memory_space<vmem>>, vector<1x8x128xbf16>
    %165 = vector.shape_cast %164 : vector<1x8x128xbf16> to vector<8x128xbf16>
    %166 = arith.extf %165 : vector<8x128xbf16> to vector<8x128xf32>
    %cst_85 = arith.constant 0.000000e+00 : f32
    %167 = vector.broadcast %cst_85 : f32 to vector<8x128xf32>
    %168 = arith.maximumf %166, %167 : vector<8x128xf32>
    %169 = arith.addf %163, %168 : vector<8x128xf32>
    %c43 = arith.constant 43 : index
    %c0_86 = arith.constant 0 : index
    %c0_87 = arith.constant 0 : index
    %170 = vector.load %arg1[%c43, %c0_86, %c0_87] : memref<64x8x128xbf16, #tpu.memory_space<vmem>>, vector<1x8x128xbf16>
    %171 = vector.shape_cast %170 : vector<1x8x128xbf16> to vector<8x128xbf16>
    %172 = arith.extf %171 : vector<8x128xbf16> to vector<8x128xf32>
    %cst_88 = arith.constant 0.000000e+00 : f32
    %173 = vector.broadcast %cst_88 : f32 to vector<8x128xf32>
    %174 = arith.maximumf %172, %173 : vector<8x128xf32>
    %175 = arith.addf %151, %174 : vector<8x128xf32>
    %c51 = arith.constant 51 : index
    %c0_89 = arith.constant 0 : index
    %c0_90 = arith.constant 0 : index
    %176 = vector.load %arg1[%c51, %c0_89, %c0_90] : memref<64x8x128xbf16, #tpu.memory_space<vmem>>, vector<1x8x128xbf16>
    %177 = vector.shape_cast %176 : vector<1x8x128xbf16> to vector<8x128xbf16>
    %178 = arith.extf %177 : vector<8x128xbf16> to vector<8x128xf32>
    %cst_91 = arith.constant 0.000000e+00 : f32
    %179 = vector.broadcast %cst_91 : f32 to vector<8x128xf32>
    %180 = arith.maximumf %178, %179 : vector<8x128xf32>
    %181 = arith.addf %175, %180 : vector<8x128xf32>
    %c59 = arith.constant 59 : index
    %c0_92 = arith.constant 0 : index
    %c0_93 = arith.constant 0 : index
    %182 = vector.load %arg1[%c59, %c0_92, %c0_93] : memref<64x8x128xbf16, #tpu.memory_space<vmem>>, vector<1x8x128xbf16>
    %183 = vector.shape_cast %182 : vector<1x8x128xbf16> to vector<8x128xbf16>
    %184 = arith.extf %183 : vector<8x128xbf16> to vector<8x128xf32>
    %cst_94 = arith.constant 0.000000e+00 : f32
    %185 = vector.broadcast %cst_94 : f32 to vector<8x128xf32>
    %186 = arith.maximumf %184, %185 : vector<8x128xf32>
    %187 = arith.addf %181, %186 : vector<8x128xf32>
    %c28 = arith.constant 28 : index
    %c0_95 = arith.constant 0 : index
    %c0_96 = arith.constant 0 : index
    %188 = vector.load %arg1[%c28, %c0_95, %c0_96] : memref<64x8x128xbf16, #tpu.memory_space<vmem>>, vector<1x8x128xbf16>
    %189 = vector.shape_cast %188 : vector<1x8x128xbf16> to vector<8x128xbf16>
    %190 = arith.extf %189 : vector<8x128xbf16> to vector<8x128xf32>
    %cst_97 = arith.constant 0.000000e+00 : f32
    %191 = vector.broadcast %cst_97 : f32 to vector<8x128xf32>
    %192 = arith.maximumf %190, %191 : vector<8x128xf32>
    %c36 = arith.constant 36 : index
    %c0_98 = arith.constant 0 : index
    %c0_99 = arith.constant 0 : index
    %193 = vector.load %arg1[%c36, %c0_98, %c0_99] : memref<64x8x128xbf16, #tpu.memory_space<vmem>>, vector<1x8x128xbf16>
    %194 = vector.shape_cast %193 : vector<1x8x128xbf16> to vector<8x128xbf16>
    %195 = arith.extf %194 : vector<8x128xbf16> to vector<8x128xf32>
    %cst_100 = arith.constant 0.000000e+00 : f32
    %196 = vector.broadcast %cst_100 : f32 to vector<8x128xf32>
    %197 = arith.maximumf %195, %196 : vector<8x128xf32>
    %198 = arith.addf %192, %197 : vector<8x128xf32>
    %c4 = arith.constant 4 : index
    %c0_101 = arith.constant 0 : index
    %c0_102 = arith.constant 0 : index
    %199 = vector.load %arg1[%c4, %c0_101, %c0_102] : memref<64x8x128xbf16, #tpu.memory_space<vmem>>, vector<1x8x128xbf16>
    %200 = vector.shape_cast %199 : vector<1x8x128xbf16> to vector<8x128xbf16>
    %201 = arith.extf %200 : vector<8x128xbf16> to vector<8x128xf32>
    %cst_103 = arith.constant 0.000000e+00 : f32
    %202 = vector.broadcast %cst_103 : f32 to vector<8x128xf32>
    %203 = arith.maximumf %201, %202 : vector<8x128xf32>
    %204 = arith.addf %198, %203 : vector<8x128xf32>
    %c12 = arith.constant 12 : index
    %c0_104 = arith.constant 0 : index
    %c0_105 = arith.constant 0 : index
    %205 = vector.load %arg1[%c12, %c0_104, %c0_105] : memref<64x8x128xbf16, #tpu.memory_space<vmem>>, vector<1x8x128xbf16>
    %206 = vector.shape_cast %205 : vector<1x8x128xbf16> to vector<8x128xbf16>
    %207 = arith.extf %206 : vector<8x128xbf16> to vector<8x128xf32>
    %cst_106 = arith.constant 0.000000e+00 : f32
    %208 = vector.broadcast %cst_106 : f32 to vector<8x128xf32>
    %209 = arith.maximumf %207, %208 : vector<8x128xf32>
    %210 = arith.addf %204, %209 : vector<8x128xf32>
    %c20 = arith.constant 20 : index
    %c0_107 = arith.constant 0 : index
    %c0_108 = arith.constant 0 : index
    %211 = vector.load %arg1[%c20, %c0_107, %c0_108] : memref<64x8x128xbf16, #tpu.memory_space<vmem>>, vector<1x8x128xbf16>
    %212 = vector.shape_cast %211 : vector<1x8x128xbf16> to vector<8x128xbf16>
    %213 = arith.extf %212 : vector<8x128xbf16> to vector<8x128xf32>
    %cst_109 = arith.constant 0.000000e+00 : f32
    %214 = vector.broadcast %cst_109 : f32 to vector<8x128xf32>
    %215 = arith.maximumf %213, %214 : vector<8x128xf32>
    %216 = arith.addf %210, %215 : vector<8x128xf32>
    %c44 = arith.constant 44 : index
    %c0_110 = arith.constant 0 : index
    %c0_111 = arith.constant 0 : index
    %217 = vector.load %arg1[%c44, %c0_110, %c0_111] : memref<64x8x128xbf16, #tpu.memory_space<vmem>>, vector<1x8x128xbf16>
    %218 = vector.shape_cast %217 : vector<1x8x128xbf16> to vector<8x128xbf16>
    %219 = arith.extf %218 : vector<8x128xbf16> to vector<8x128xf32>
    %cst_112 = arith.constant 0.000000e+00 : f32
    %220 = vector.broadcast %cst_112 : f32 to vector<8x128xf32>
    %221 = arith.maximumf %219, %220 : vector<8x128xf32>
    %222 = arith.addf %198, %221 : vector<8x128xf32>
    %c52 = arith.constant 52 : index
    %c0_113 = arith.constant 0 : index
    %c0_114 = arith.constant 0 : index
    %223 = vector.load %arg1[%c52, %c0_113, %c0_114] : memref<64x8x128xbf16, #tpu.memory_space<vmem>>, vector<1x8x128xbf16>
    %224 = vector.shape_cast %223 : vector<1x8x128xbf16> to vector<8x128xbf16>
    %225 = arith.extf %224 : vector<8x128xbf16> to vector<8x128xf32>
    %cst_115 = arith.constant 0.000000e+00 : f32
    %226 = vector.broadcast %cst_115 : f32 to vector<8x128xf32>
    %227 = arith.maximumf %225, %226 : vector<8x128xf32>
    %228 = arith.addf %222, %227 : vector<8x128xf32>
    %c60 = arith.constant 60 : index
    %c0_116 = arith.constant 0 : index
    %c0_117 = arith.constant 0 : index
    %229 = vector.load %arg1[%c60, %c0_116, %c0_117] : memref<64x8x128xbf16, #tpu.memory_space<vmem>>, vector<1x8x128xbf16>
    %230 = vector.shape_cast %229 : vector<1x8x128xbf16> to vector<8x128xbf16>
    %231 = arith.extf %230 : vector<8x128xbf16> to vector<8x128xf32>
    %cst_118 = arith.constant 0.000000e+00 : f32
    %232 = vector.broadcast %cst_118 : f32 to vector<8x128xf32>
    %233 = arith.maximumf %231, %232 : vector<8x128xf32>
    %234 = arith.addf %228, %233 : vector<8x128xf32>
    %c29 = arith.constant 29 : index
    %c0_119 = arith.constant 0 : index
    %c0_120 = arith.constant 0 : index
    %235 = vector.load %arg1[%c29, %c0_119, %c0_120] : memref<64x8x128xbf16, #tpu.memory_space<vmem>>, vector<1x8x128xbf16>
    %236 = vector.shape_cast %235 : vector<1x8x128xbf16> to vector<8x128xbf16>
    %237 = arith.extf %236 : vector<8x128xbf16> to vector<8x128xf32>
    %cst_121 = arith.constant 0.000000e+00 : f32
    %238 = vector.broadcast %cst_121 : f32 to vector<8x128xf32>
    %239 = arith.maximumf %237, %238 : vector<8x128xf32>
    %c37 = arith.constant 37 : index
    %c0_122 = arith.constant 0 : index
    %c0_123 = arith.constant 0 : index
    %240 = vector.load %arg1[%c37, %c0_122, %c0_123] : memref<64x8x128xbf16, #tpu.memory_space<vmem>>, vector<1x8x128xbf16>
    %241 = vector.shape_cast %240 : vector<1x8x128xbf16> to vector<8x128xbf16>
    %242 = arith.extf %241 : vector<8x128xbf16> to vector<8x128xf32>
    %cst_124 = arith.constant 0.000000e+00 : f32
    %243 = vector.broadcast %cst_124 : f32 to vector<8x128xf32>
    %244 = arith.maximumf %242, %243 : vector<8x128xf32>
    %245 = arith.addf %239, %244 : vector<8x128xf32>
    %c5 = arith.constant 5 : index
    %c0_125 = arith.constant 0 : index
    %c0_126 = arith.constant 0 : index
    %246 = vector.load %arg1[%c5, %c0_125, %c0_126] : memref<64x8x128xbf16, #tpu.memory_space<vmem>>, vector<1x8x128xbf16>
    %247 = vector.shape_cast %246 : vector<1x8x128xbf16> to vector<8x128xbf16>
    %248 = arith.extf %247 : vector<8x128xbf16> to vector<8x128xf32>
    %cst_127 = arith.constant 0.000000e+00 : f32
    %249 = vector.broadcast %cst_127 : f32 to vector<8x128xf32>
    %250 = arith.maximumf %248, %249 : vector<8x128xf32>
    %251 = arith.addf %245, %250 : vector<8x128xf32>
    %c13 = arith.constant 13 : index
    %c0_128 = arith.constant 0 : index
    %c0_129 = arith.constant 0 : index
    %252 = vector.load %arg1[%c13, %c0_128, %c0_129] : memref<64x8x128xbf16, #tpu.memory_space<vmem>>, vector<1x8x128xbf16>
    %253 = vector.shape_cast %252 : vector<1x8x128xbf16> to vector<8x128xbf16>
    %254 = arith.extf %253 : vector<8x128xbf16> to vector<8x128xf32>
    %cst_130 = arith.constant 0.000000e+00 : f32
    %255 = vector.broadcast %cst_130 : f32 to vector<8x128xf32>
    %256 = arith.maximumf %254, %255 : vector<8x128xf32>
    %257 = arith.addf %251, %256 : vector<8x128xf32>
    %c21 = arith.constant 21 : index
    %c0_131 = arith.constant 0 : index
    %c0_132 = arith.constant 0 : index
    %258 = vector.load %arg1[%c21, %c0_131, %c0_132] : memref<64x8x128xbf16, #tpu.memory_space<vmem>>, vector<1x8x128xbf16>
    %259 = vector.shape_cast %258 : vector<1x8x128xbf16> to vector<8x128xbf16>
    %260 = arith.extf %259 : vector<8x128xbf16> to vector<8x128xf32>
    %cst_133 = arith.constant 0.000000e+00 : f32
    %261 = vector.broadcast %cst_133 : f32 to vector<8x128xf32>
    %262 = arith.maximumf %260, %261 : vector<8x128xf32>
    %263 = arith.addf %257, %262 : vector<8x128xf32>
    %c45 = arith.constant 45 : index
    %c0_134 = arith.constant 0 : index
    %c0_135 = arith.constant 0 : index
    %264 = vector.load %arg1[%c45, %c0_134, %c0_135] : memref<64x8x128xbf16, #tpu.memory_space<vmem>>, vector<1x8x128xbf16>
    %265 = vector.shape_cast %264 : vector<1x8x128xbf16> to vector<8x128xbf16>
    %266 = arith.extf %265 : vector<8x128xbf16> to vector<8x128xf32>
    %cst_136 = arith.constant 0.000000e+00 : f32
    %267 = vector.broadcast %cst_136 : f32 to vector<8x128xf32>
    %268 = arith.maximumf %266, %267 : vector<8x128xf32>
    %269 = arith.addf %245, %268 : vector<8x128xf32>
    %c53 = arith.constant 53 : index
    %c0_137 = arith.constant 0 : index
    %c0_138 = arith.constant 0 : index
    %270 = vector.load %arg1[%c53, %c0_137, %c0_138] : memref<64x8x128xbf16, #tpu.memory_space<vmem>>, vector<1x8x128xbf16>
    %271 = vector.shape_cast %270 : vector<1x8x128xbf16> to vector<8x128xbf16>
    %272 = arith.extf %271 : vector<8x128xbf16> to vector<8x128xf32>
    %cst_139 = arith.constant 0.000000e+00 : f32
    %273 = vector.broadcast %cst_139 : f32 to vector<8x128xf32>
    %274 = arith.maximumf %272, %273 : vector<8x128xf32>
    %275 = arith.addf %269, %274 : vector<8x128xf32>
    %c61 = arith.constant 61 : index
    %c0_140 = arith.constant 0 : index
    %c0_141 = arith.constant 0 : index
    %276 = vector.load %arg1[%c61, %c0_140, %c0_141] : memref<64x8x128xbf16, #tpu.memory_space<vmem>>, vector<1x8x128xbf16>
    %277 = vector.shape_cast %276 : vector<1x8x128xbf16> to vector<8x128xbf16>
    %278 = arith.extf %277 : vector<8x128xbf16> to vector<8x128xf32>
    %cst_142 = arith.constant 0.000000e+00 : f32
    %279 = vector.broadcast %cst_142 : f32 to vector<8x128xf32>
    %280 = arith.maximumf %278, %279 : vector<8x128xf32>
    %281 = arith.addf %275, %280 : vector<8x128xf32>
    %c30 = arith.constant 30 : index
    %c0_143 = arith.constant 0 : index
    %c0_144 = arith.constant 0 : index
    %282 = vector.load %arg1[%c30, %c0_143, %c0_144] : memref<64x8x128xbf16, #tpu.memory_space<vmem>>, vector<1x8x128xbf16>
    %283 = vector.shape_cast %282 : vector<1x8x128xbf16> to vector<8x128xbf16>
    %284 = arith.extf %283 : vector<8x128xbf16> to vector<8x128xf32>
    %cst_145 = arith.constant 0.000000e+00 : f32
    %285 = vector.broadcast %cst_145 : f32 to vector<8x128xf32>
    %286 = arith.maximumf %284, %285 : vector<8x128xf32>
    %c38 = arith.constant 38 : index
    %c0_146 = arith.constant 0 : index
    %c0_147 = arith.constant 0 : index
    %287 = vector.load %arg1[%c38, %c0_146, %c0_147] : memref<64x8x128xbf16, #tpu.memory_space<vmem>>, vector<1x8x128xbf16>
    %288 = vector.shape_cast %287 : vector<1x8x128xbf16> to vector<8x128xbf16>
    %289 = arith.extf %288 : vector<8x128xbf16> to vector<8x128xf32>
    %cst_148 = arith.constant 0.000000e+00 : f32
    %290 = vector.broadcast %cst_148 : f32 to vector<8x128xf32>
    %291 = arith.maximumf %289, %290 : vector<8x128xf32>
    %292 = arith.addf %286, %291 : vector<8x128xf32>
    %c6 = arith.constant 6 : index
    %c0_149 = arith.constant 0 : index
    %c0_150 = arith.constant 0 : index
    %293 = vector.load %arg1[%c6, %c0_149, %c0_150] : memref<64x8x128xbf16, #tpu.memory_space<vmem>>, vector<1x8x128xbf16>
    %294 = vector.shape_cast %293 : vector<1x8x128xbf16> to vector<8x128xbf16>
    %295 = arith.extf %294 : vector<8x128xbf16> to vector<8x128xf32>
    %cst_151 = arith.constant 0.000000e+00 : f32
    %296 = vector.broadcast %cst_151 : f32 to vector<8x128xf32>
    %297 = arith.maximumf %295, %296 : vector<8x128xf32>
    %298 = arith.addf %292, %297 : vector<8x128xf32>
    %c14 = arith.constant 14 : index
    %c0_152 = arith.constant 0 : index
    %c0_153 = arith.constant 0 : index
    %299 = vector.load %arg1[%c14, %c0_152, %c0_153] : memref<64x8x128xbf16, #tpu.memory_space<vmem>>, vector<1x8x128xbf16>
    %300 = vector.shape_cast %299 : vector<1x8x128xbf16> to vector<8x128xbf16>
    %301 = arith.extf %300 : vector<8x128xbf16> to vector<8x128xf32>
    %cst_154 = arith.constant 0.000000e+00 : f32
    %302 = vector.broadcast %cst_154 : f32 to vector<8x128xf32>
    %303 = arith.maximumf %301, %302 : vector<8x128xf32>
    %304 = arith.addf %298, %303 : vector<8x128xf32>
    %c22 = arith.constant 22 : index
    %c0_155 = arith.constant 0 : index
    %c0_156 = arith.constant 0 : index
    %305 = vector.load %arg1[%c22, %c0_155, %c0_156] : memref<64x8x128xbf16, #tpu.memory_space<vmem>>, vector<1x8x128xbf16>
    %306 = vector.shape_cast %305 : vector<1x8x128xbf16> to vector<8x128xbf16>
    %307 = arith.extf %306 : vector<8x128xbf16> to vector<8x128xf32>
    %cst_157 = arith.constant 0.000000e+00 : f32
    %308 = vector.broadcast %cst_157 : f32 to vector<8x128xf32>
    %309 = arith.maximumf %307, %308 : vector<8x128xf32>
    %310 = arith.addf %304, %309 : vector<8x128xf32>
    %c46 = arith.constant 46 : index
    %c0_158 = arith.constant 0 : index
    %c0_159 = arith.constant 0 : index
    %311 = vector.load %arg1[%c46, %c0_158, %c0_159] : memref<64x8x128xbf16, #tpu.memory_space<vmem>>, vector<1x8x128xbf16>
    %312 = vector.shape_cast %311 : vector<1x8x128xbf16> to vector<8x128xbf16>
    %313 = arith.extf %312 : vector<8x128xbf16> to vector<8x128xf32>
    %cst_160 = arith.constant 0.000000e+00 : f32
    %314 = vector.broadcast %cst_160 : f32 to vector<8x128xf32>
    %315 = arith.maximumf %313, %314 : vector<8x128xf32>
    %316 = arith.addf %292, %315 : vector<8x128xf32>
    %c54 = arith.constant 54 : index
    %c0_161 = arith.constant 0 : index
    %c0_162 = arith.constant 0 : index
    %317 = vector.load %arg1[%c54, %c0_161, %c0_162] : memref<64x8x128xbf16, #tpu.memory_space<vmem>>, vector<1x8x128xbf16>
    %318 = vector.shape_cast %317 : vector<1x8x128xbf16> to vector<8x128xbf16>
    %319 = arith.extf %318 : vector<8x128xbf16> to vector<8x128xf32>
    %cst_163 = arith.constant 0.000000e+00 : f32
    %320 = vector.broadcast %cst_163 : f32 to vector<8x128xf32>
    %321 = arith.maximumf %319, %320 : vector<8x128xf32>
    %322 = arith.addf %316, %321 : vector<8x128xf32>
    %c62 = arith.constant 62 : index
    %c0_164 = arith.constant 0 : index
    %c0_165 = arith.constant 0 : index
    %323 = vector.load %arg1[%c62, %c0_164, %c0_165] : memref<64x8x128xbf16, #tpu.memory_space<vmem>>, vector<1x8x128xbf16>
    %324 = vector.shape_cast %323 : vector<1x8x128xbf16> to vector<8x128xbf16>
    %325 = arith.extf %324 : vector<8x128xbf16> to vector<8x128xf32>
    %cst_166 = arith.constant 0.000000e+00 : f32
    %326 = vector.broadcast %cst_166 : f32 to vector<8x128xf32>
    %327 = arith.maximumf %325, %326 : vector<8x128xf32>
    %328 = arith.addf %322, %327 : vector<8x128xf32>
    %c31 = arith.constant 31 : index
    %c0_167 = arith.constant 0 : index
    %c0_168 = arith.constant 0 : index
    %329 = vector.load %arg1[%c31, %c0_167, %c0_168] : memref<64x8x128xbf16, #tpu.memory_space<vmem>>, vector<1x8x128xbf16>
    %330 = vector.shape_cast %329 : vector<1x8x128xbf16> to vector<8x128xbf16>
    %331 = arith.extf %330 : vector<8x128xbf16> to vector<8x128xf32>
    %cst_169 = arith.constant 0.000000e+00 : f32
    %332 = vector.broadcast %cst_169 : f32 to vector<8x128xf32>
    %333 = arith.maximumf %331, %332 : vector<8x128xf32>
    %c39 = arith.constant 39 : index
    %c0_170 = arith.constant 0 : index
    %c0_171 = arith.constant 0 : index
    %334 = vector.load %arg1[%c39, %c0_170, %c0_171] : memref<64x8x128xbf16, #tpu.memory_space<vmem>>, vector<1x8x128xbf16>
    %335 = vector.shape_cast %334 : vector<1x8x128xbf16> to vector<8x128xbf16>
    %336 = arith.extf %335 : vector<8x128xbf16> to vector<8x128xf32>
    %cst_172 = arith.constant 0.000000e+00 : f32
    %337 = vector.broadcast %cst_172 : f32 to vector<8x128xf32>
    %338 = arith.maximumf %336, %337 : vector<8x128xf32>
    %339 = arith.addf %333, %338 : vector<8x128xf32>
    %c7 = arith.constant 7 : index
    %c0_173 = arith.constant 0 : index
    %c0_174 = arith.constant 0 : index
    %340 = vector.load %arg1[%c7, %c0_173, %c0_174] : memref<64x8x128xbf16, #tpu.memory_space<vmem>>, vector<1x8x128xbf16>
    %341 = vector.shape_cast %340 : vector<1x8x128xbf16> to vector<8x128xbf16>
    %342 = arith.extf %341 : vector<8x128xbf16> to vector<8x128xf32>
    %cst_175 = arith.constant 0.000000e+00 : f32
    %343 = vector.broadcast %cst_175 : f32 to vector<8x128xf32>
    %344 = arith.maximumf %342, %343 : vector<8x128xf32>
    %345 = arith.addf %339, %344 : vector<8x128xf32>
    %c15 = arith.constant 15 : index
    %c0_176 = arith.constant 0 : index
    %c0_177 = arith.constant 0 : index
    %346 = vector.load %arg1[%c15, %c0_176, %c0_177] : memref<64x8x128xbf16, #tpu.memory_space<vmem>>, vector<1x8x128xbf16>
    %347 = vector.shape_cast %346 : vector<1x8x128xbf16> to vector<8x128xbf16>
    %348 = arith.extf %347 : vector<8x128xbf16> to vector<8x128xf32>
    %cst_178 = arith.constant 0.000000e+00 : f32
    %349 = vector.broadcast %cst_178 : f32 to vector<8x128xf32>
    %350 = arith.maximumf %348, %349 : vector<8x128xf32>
    %351 = arith.addf %345, %350 : vector<8x128xf32>
    %c23 = arith.constant 23 : index
    %c0_179 = arith.constant 0 : index
    %c0_180 = arith.constant 0 : index
    %352 = vector.load %arg1[%c23, %c0_179, %c0_180] : memref<64x8x128xbf16, #tpu.memory_space<vmem>>, vector<1x8x128xbf16>
    %353 = vector.shape_cast %352 : vector<1x8x128xbf16> to vector<8x128xbf16>
    %354 = arith.extf %353 : vector<8x128xbf16> to vector<8x128xf32>
    %cst_181 = arith.constant 0.000000e+00 : f32
    %355 = vector.broadcast %cst_181 : f32 to vector<8x128xf32>
    %356 = arith.maximumf %354, %355 : vector<8x128xf32>
    %357 = arith.addf %351, %356 : vector<8x128xf32>
    %c47 = arith.constant 47 : index
    %c0_182 = arith.constant 0 : index
    %c0_183 = arith.constant 0 : index
    %358 = vector.load %arg1[%c47, %c0_182, %c0_183] : memref<64x8x128xbf16, #tpu.memory_space<vmem>>, vector<1x8x128xbf16>
    %359 = vector.shape_cast %358 : vector<1x8x128xbf16> to vector<8x128xbf16>
    %360 = arith.extf %359 : vector<8x128xbf16> to vector<8x128xf32>
    %cst_184 = arith.constant 0.000000e+00 : f32
    %361 = vector.broadcast %cst_184 : f32 to vector<8x128xf32>
    %362 = arith.maximumf %360, %361 : vector<8x128xf32>
    %363 = arith.addf %339, %362 : vector<8x128xf32>
    %c55 = arith.constant 55 : index
    %c0_185 = arith.constant 0 : index
    %c0_186 = arith.constant 0 : index
    %364 = vector.load %arg1[%c55, %c0_185, %c0_186] : memref<64x8x128xbf16, #tpu.memory_space<vmem>>, vector<1x8x128xbf16>
    %365 = vector.shape_cast %364 : vector<1x8x128xbf16> to vector<8x128xbf16>
    %366 = arith.extf %365 : vector<8x128xbf16> to vector<8x128xf32>
    %cst_187 = arith.constant 0.000000e+00 : f32
    %367 = vector.broadcast %cst_187 : f32 to vector<8x128xf32>
    %368 = arith.maximumf %366, %367 : vector<8x128xf32>
    %369 = arith.addf %363, %368 : vector<8x128xf32>
    %c63 = arith.constant 63 : index
    %c0_188 = arith.constant 0 : index
    %c0_189 = arith.constant 0 : index
    %370 = vector.load %arg1[%c63, %c0_188, %c0_189] : memref<64x8x128xbf16, #tpu.memory_space<vmem>>, vector<1x8x128xbf16>
    %371 = vector.shape_cast %370 : vector<1x8x128xbf16> to vector<8x128xbf16>
    %372 = arith.extf %371 : vector<8x128xbf16> to vector<8x128xf32>
    %cst_190 = arith.constant 0.000000e+00 : f32
    %373 = vector.broadcast %cst_190 : f32 to vector<8x128xf32>
    %374 = arith.maximumf %372, %373 : vector<8x128xf32>
    %375 = arith.addf %369, %374 : vector<8x128xf32>
    %376 = arith.addf %169, %216 : vector<8x128xf32>
    %377 = arith.addf %376, %28 : vector<8x128xf32>
    %378 = arith.addf %377, %75 : vector<8x128xf32>
    %379 = arith.addf %378, %122 : vector<8x128xf32>
    %380 = arith.addf %376, %263 : vector<8x128xf32>
    %381 = arith.addf %380, %310 : vector<8x128xf32>
    %382 = arith.addf %381, %357 : vector<8x128xf32>
    %383 = arith.addf %187, %234 : vector<8x128xf32>
    %384 = arith.addf %383, %46 : vector<8x128xf32>
    %385 = arith.addf %384, %93 : vector<8x128xf32>
    %386 = arith.addf %385, %140 : vector<8x128xf32>
    %387 = arith.addf %383, %281 : vector<8x128xf32>
    %388 = arith.addf %387, %328 : vector<8x128xf32>
    %389 = arith.addf %388, %375 : vector<8x128xf32>
    %cst_191 = arith.constant 0.000000e+00 : f32
    %390 = vector.broadcast %cst_191 : f32 to vector<8x768xf32>
    %391 = arith.truncf %379 : vector<8x128xf32> to vector<8x128xbf16>
    %c0_192 = arith.constant 0 : index
    %c0_193 = arith.constant 0 : index
    %392 = vector.load %arg2[%c0_192, %c0_193] : memref<128x128xbf16, #tpu.memory_space<vmem>>, vector<128x128xbf16>
    %cst_194 = arith.constant dense<0.000000e+00> : vector<8x128xf32>
    %393 = tpu.matmul %391, %392, %cst_194 {dimension_numbers = #tpu.dot_dimension_numbers<[1], [0], [0], [1], [0, 0, 1, 1], [], []>} : vector<8x128xbf16>, vector<128x128xbf16>, vector<8x128xf32> -> vector<8x128xf32>
    %c0_195 = arith.constant 0 : index
    %c0_196 = arith.constant 0 : index
    %394 = vector.load %arg3[%c0_195, %c0_196] : memref<1x128xf32, #tpu.memory_space<vmem>>, vector<1x128xf32>
    %395 = vector.broadcast %394 : vector<1x128xf32> to vector<8x128xf32>
    %396 = arith.addf %393, %395 : vector<8x128xf32>
    %cst_197 = arith.constant 0.000000e+00 : f32
    %397 = vector.broadcast %cst_197 : f32 to vector<8x128xf32>
    %398 = arith.maximumf %396, %397 : vector<8x128xf32>
    %399 = arith.truncf %398 : vector<8x128xf32> to vector<8x128xbf16>
    %c0_198 = arith.constant 0 : index
    %c0_199 = arith.constant 0 : index
    %400 = vector.load %arg4[%c0_198, %c0_199] : memref<512x768xbf16, #tpu.memory_space<vmem>>, vector<128x768xbf16>
    %cst_200 = arith.constant dense<0.000000e+00> : vector<8x768xf32>
    %401 = tpu.matmul %399, %400, %cst_200 {dimension_numbers = #tpu.dot_dimension_numbers<[1], [0], [0], [1], [0, 0, 1, 1], [], []>} : vector<8x128xbf16>, vector<128x768xbf16>, vector<8x768xf32> -> vector<8x768xf32>
    %402 = arith.addf %390, %401 : vector<8x768xf32>
    %403 = arith.truncf %382 : vector<8x128xf32> to vector<8x128xbf16>
    %c0_201 = arith.constant 0 : index
    %c0_202 = arith.constant 0 : index
    %404 = vector.load %arg2[%c0_201, %c0_202] : memref<128x128xbf16, #tpu.memory_space<vmem>>, vector<128x128xbf16>
    %cst_203 = arith.constant dense<0.000000e+00> : vector<8x128xf32>
    %405 = tpu.matmul %403, %404, %cst_203 {dimension_numbers = #tpu.dot_dimension_numbers<[1], [0], [0], [1], [0, 0, 1, 1], [], []>} : vector<8x128xbf16>, vector<128x128xbf16>, vector<8x128xf32> -> vector<8x128xf32>
    %c0_204 = arith.constant 0 : index
    %c0_205 = arith.constant 0 : index
    %406 = vector.load %arg3[%c0_204, %c0_205] : memref<1x128xf32, #tpu.memory_space<vmem>>, vector<1x128xf32>
    %407 = vector.broadcast %406 : vector<1x128xf32> to vector<8x128xf32>
    %408 = arith.addf %405, %407 : vector<8x128xf32>
    %cst_206 = arith.constant 0.000000e+00 : f32
    %409 = vector.broadcast %cst_206 : f32 to vector<8x128xf32>
    %410 = arith.maximumf %408, %409 : vector<8x128xf32>
    %411 = arith.truncf %410 : vector<8x128xf32> to vector<8x128xbf16>
    %c128 = arith.constant 128 : index
    %c0_207 = arith.constant 0 : index
    %412 = vector.load %arg4[%c128, %c0_207] : memref<512x768xbf16, #tpu.memory_space<vmem>>, vector<128x768xbf16>
    %cst_208 = arith.constant dense<0.000000e+00> : vector<8x768xf32>
    %413 = tpu.matmul %411, %412, %cst_208 {dimension_numbers = #tpu.dot_dimension_numbers<[1], [0], [0], [1], [0, 0, 1, 1], [], []>} : vector<8x128xbf16>, vector<128x768xbf16>, vector<8x768xf32> -> vector<8x768xf32>
    %414 = arith.addf %402, %413 : vector<8x768xf32>
    %415 = arith.truncf %386 : vector<8x128xf32> to vector<8x128xbf16>
    %c0_209 = arith.constant 0 : index
    %c0_210 = arith.constant 0 : index
    %416 = vector.load %arg2[%c0_209, %c0_210] : memref<128x128xbf16, #tpu.memory_space<vmem>>, vector<128x128xbf16>
    %cst_211 = arith.constant dense<0.000000e+00> : vector<8x128xf32>
    %417 = tpu.matmul %415, %416, %cst_211 {dimension_numbers = #tpu.dot_dimension_numbers<[1], [0], [0], [1], [0, 0, 1, 1], [], []>} : vector<8x128xbf16>, vector<128x128xbf16>, vector<8x128xf32> -> vector<8x128xf32>
    %c0_212 = arith.constant 0 : index
    %c0_213 = arith.constant 0 : index
    %418 = vector.load %arg3[%c0_212, %c0_213] : memref<1x128xf32, #tpu.memory_space<vmem>>, vector<1x128xf32>
    %419 = vector.broadcast %418 : vector<1x128xf32> to vector<8x128xf32>
    %420 = arith.addf %417, %419 : vector<8x128xf32>
    %cst_214 = arith.constant 0.000000e+00 : f32
    %421 = vector.broadcast %cst_214 : f32 to vector<8x128xf32>
    %422 = arith.maximumf %420, %421 : vector<8x128xf32>
    %423 = arith.truncf %422 : vector<8x128xf32> to vector<8x128xbf16>
    %c256 = arith.constant 256 : index
    %c0_215 = arith.constant 0 : index
    %424 = vector.load %arg4[%c256, %c0_215] : memref<512x768xbf16, #tpu.memory_space<vmem>>, vector<128x768xbf16>
    %cst_216 = arith.constant dense<0.000000e+00> : vector<8x768xf32>
    %425 = tpu.matmul %423, %424, %cst_216 {dimension_numbers = #tpu.dot_dimension_numbers<[1], [0], [0], [1], [0, 0, 1, 1], [], []>} : vector<8x128xbf16>, vector<128x768xbf16>, vector<8x768xf32> -> vector<8x768xf32>
    %426 = arith.addf %414, %425 : vector<8x768xf32>
    %427 = arith.truncf %389 : vector<8x128xf32> to vector<8x128xbf16>
    %c0_217 = arith.constant 0 : index
    %c0_218 = arith.constant 0 : index
    %428 = vector.load %arg2[%c0_217, %c0_218] : memref<128x128xbf16, #tpu.memory_space<vmem>>, vector<128x128xbf16>
    %cst_219 = arith.constant dense<0.000000e+00> : vector<8x128xf32>
    %429 = tpu.matmul %427, %428, %cst_219 {dimension_numbers = #tpu.dot_dimension_numbers<[1], [0], [0], [1], [0, 0, 1, 1], [], []>} : vector<8x128xbf16>, vector<128x128xbf16>, vector<8x128xf32> -> vector<8x128xf32>
    %c0_220 = arith.constant 0 : index
    %c0_221 = arith.constant 0 : index
    %430 = vector.load %arg3[%c0_220, %c0_221] : memref<1x128xf32, #tpu.memory_space<vmem>>, vector<1x128xf32>
    %431 = vector.broadcast %430 : vector<1x128xf32> to vector<8x128xf32>
    %432 = arith.addf %429, %431 : vector<8x128xf32>
    %cst_222 = arith.constant 0.000000e+00 : f32
    %433 = vector.broadcast %cst_222 : f32 to vector<8x128xf32>
    %434 = arith.maximumf %432, %433 : vector<8x128xf32>
    %435 = arith.truncf %434 : vector<8x128xf32> to vector<8x128xbf16>
    %c384 = arith.constant 384 : index
    %c0_223 = arith.constant 0 : index
    %436 = vector.load %arg4[%c384, %c0_223] : memref<512x768xbf16, #tpu.memory_space<vmem>>, vector<128x768xbf16>
    %cst_224 = arith.constant dense<0.000000e+00> : vector<8x768xf32>
    %437 = tpu.matmul %435, %436, %cst_224 {dimension_numbers = #tpu.dot_dimension_numbers<[1], [0], [0], [1], [0, 0, 1, 1], [], []>} : vector<8x128xbf16>, vector<128x768xbf16>, vector<8x768xf32> -> vector<8x768xf32>
    %438 = arith.addf %426, %437 : vector<8x768xf32>
    %c0_225 = arith.constant 0 : index
    %c0_226 = arith.constant 0 : index
    %439 = vector.load %arg5[%c0_225, %c0_226] : memref<1x768xf32, #tpu.memory_space<vmem>>, vector<1x768xf32>
    %440 = vector.broadcast %439 : vector<1x768xf32> to vector<8x768xf32>
    %441 = arith.addf %438, %440 : vector<8x768xf32>
    %cst_227 = arith.constant 0.000000e+00 : f32
    %442 = vector.broadcast %cst_227 : f32 to vector<8x768xf32>
    %443 = arith.maximumf %441, %442 : vector<8x768xf32>
    %444 = arith.truncf %443 : vector<8x768xf32> to vector<8x768xbf16>
    %c0_228 = arith.constant 0 : index
    %c0_229 = arith.constant 0 : index
    %445 = vector.load %arg6[%c0_228, %c0_229] : memref<768x128xbf16, #tpu.memory_space<vmem>>, vector<768x128xbf16>
    %cst_230 = arith.constant dense<0.000000e+00> : vector<8x128xf32>
    %446 = tpu.matmul %444, %445, %cst_230 {dimension_numbers = #tpu.dot_dimension_numbers<[1], [0], [0], [1], [0, 0, 1, 1], [], []>} : vector<8x768xbf16>, vector<768x128xbf16>, vector<8x128xf32> -> vector<8x128xf32>
    %c0_231 = arith.constant 0 : index
    %c0_232 = arith.constant 0 : index
    %447 = vector.load %arg7[%c0_231, %c0_232] : memref<1x128xf32, #tpu.memory_space<vmem>>, vector<1x128xf32>
    %448 = vector.broadcast %447 : vector<1x128xf32> to vector<8x128xf32>
    %449 = arith.addf %446, %448 : vector<8x128xf32>
    %c0_233 = arith.constant 0 : index
    %c0_234 = arith.constant 0 : index
    %450 = vector.load %arg8[%c0_233, %c0_234] : memref<8x128xf32, #tpu.memory_space<vmem>>, vector<8x128xf32>
    tpu.vector_store %arg8[%c0_233, %c0_234], %449 {strides = array<i32>} : memref<8x128xf32, #tpu.memory_space<vmem>>, vector<8x128xf32>,
    return
  }
  func.func @transform_0(%arg0: i32) -> (i32, i32, i32) {
    %c0_i32 = arith.constant 0 : i32
    %c0_i32_0 = arith.constant 0 : i32
    %c0_i32_1 = arith.constant 0 : i32
    return %c0_i32, %arg0, %c0_i32_0 : i32, i32, i32
  }
  func.func @transform_1(%arg0: i32) -> (i32, i32) {
    %c0_i32 = arith.constant 0 : i32
    %c0_i32_0 = arith.constant 0 : i32
    %c0_i32_1 = arith.constant 0 : i32
    return %c0_i32, %c0_i32_0 : i32, i32
  }
  func.func @transform_2(%arg0: i32) -> (i32, i32) {
    %c0_i32 = arith.constant 0 : i32
    %c0_i32_0 = arith.constant 0 : i32
    %c0_i32_1 = arith.constant 0 : i32
    return %c0_i32, %c0_i32_0 : i32, i32
  }
  func.func @transform_3(%arg0: i32) -> (i32, i32) {
    %c0_i32 = arith.constant 0 : i32
    %c0_i32_0 = arith.constant 0 : i32
    %c0_i32_1 = arith.constant 0 : i32
    return %c0_i32, %c0_i32_0 : i32, i32
  }
  func.func @transform_4(%arg0: i32) -> (i32, i32) {
    %c0_i32 = arith.constant 0 : i32
    %c0_i32_0 = arith.constant 0 : i32
    %c0_i32_1 = arith.constant 0 : i32
    return %c0_i32, %c0_i32_0 : i32, i32
  }
  func.func @transform_5(%arg0: i32) -> (i32, i32) {
    %c0_i32 = arith.constant 0 : i32
    %c0_i32_0 = arith.constant 0 : i32
    %c0_i32_1 = arith.constant 0 : i32
    return %c0_i32, %c0_i32_0 : i32, i32
  }
  func.func @transform_6(%arg0: i32) -> (i32, i32) {
    %c0_i32 = arith.constant 0 : i32
    %c0_i32_0 = arith.constant 0 : i32
    %c0_i32_1 = arith.constant 0 : i32
    return %c0_i32, %c0_i32_0 : i32, i32
  }
  func.func @transform_7(%arg0: i32) -> (i32, i32) {
    %c0_i32 = arith.constant 0 : i32
    %c0_i32_0 = arith.constant 0 : i32
    return %arg0, %c0_i32 : i32, i32
  }
}

</mosaic_0001>

<bundles_post_ra>
// kernel: tpu_custom_call.1
= control target key start
LH: loop header
LB: loop body
LE: loop exit
PB: predicated region body
PF: predicated region fallthrough
CT: control target
= control target key end

     0   :  { %12 = vsyncpa [#allocation3], 0  ;;  %s4162_s0 = inlined_call_operand.hbm [shape: bf16[64,8,128], index: 0, kind: input, shape index: {}]   ;;  %s4163_s1 = inlined_call_operand.hbm [shape: bf16[128,128], index: 1, kind: input, shape index: {}]   ;;  %s4164_s2 = inlined_call_operand.vmem [shape: f32[1,128], index: 2, kind: input, shape index: {}]   ;;  %s4165_s3 = inlined_call_operand.hbm [shape: bf16[512,768], index: 3, kind: input, shape index: {}]   ;;  %s4166_s4 = inlined_call_operand.vmem [shape: f32[1,768], index: 4, kind: input, shape index: {}]   ;;  %s4167_s5 = inlined_call_operand.hbm [shape: bf16[768,128], index: 5, kind: input, shape index: {}]   ;;  %s4168_s6 = inlined_call_operand.vmem [shape: f32[1,128], index: 6, kind: input, shape index: {}]   ;;  %s4169_s7 = inlined_call_operand.hbm [shape: f32[8,128], index: 7, kind: output, shape index: {}]  }
   0x1   :  { %13 = vsyncpa [#allocation6], 0 }
   0x2   :  { %14 = vsyncpa [#allocation9], 0 }
   0x3   :  { %15 = vsyncpa [#allocation4], 0  ;;  %s3800_s24 = smov [#allocation5]   ;;  %s3801_s26 = smov [#allocation2]  }
   0x4   :  { %s33_s25 = sshll.u32 %s3800_s24, 4  ;;  %s21_s27 = sshll.u32 %s3801_s26, 4  ;;  %s34_s25 = int_to_ptr.vmem [resolvable:$true] %s33_s25  ;;  %s3852_s27 = int_to_ptr.vmem [resolvable:$true] %s21_s27 }
   0x5   :  { %s3682_s30 = scalar_lea.hbm %s4163_s1, 1024 }
   0x6   :  { %p3683_p0 = scmp.ne.s32.totalorder %s4163_s1, %s3682_s30  ;;  %p3686_p1 = scmp.lt.u32.totalorder %s3682_s30, %s4163_s1 }
   0x8   :  { %p3688_p2 = pnand %p3686_p1, %p3683_p0 }
   0xa   :  { %3691 = shalt.err (!%p3688_p2)
}
   0xb   :  { %s3692_s12 = scalar_lea.vmem %s34_s25, 1024  ;;  %p3697_p4 = scmp.lt.s32.totalorder %s34_s25, %s34_s25 }
   0xc   :  { %p3693_p3 = scmp.ne.s32.totalorder %s34_s25, %s3692_s12  ;;  %p3698_p5 = scmp.lt.s32.totalorder %s3692_s12, %s3692_s12 }
   0xe   :  { %p3699_p6 = por %p3698_p5, %p3697_p4 }
  0x10   :  { %p3700_p7 = pnand %p3699_p6, %p3693_p3 }
  0x12   :  { %3703 = shalt.err (!%p3700_p7)
}
  0x13   :  { %s3802_s13 = smov 64   ;;  %s3803_s14 = smov 4  }
  0x14   :  { %39 = dma.hbm_to_vmem [thread:$0]  %s4163_s1, 1024, %s34_s25, [#allocation6], %s3802_s13, %s3802_s13, %s3803_s14  }
  0x15   :  { %s3704_s19 = scalar_lea.hbm %s4162_s0, 4096 }
  0x16   :  { %p3705_p8 = scmp.ne.s32.totalorder %s4162_s0, %s3704_s19  ;;  %p3708_p9 = scmp.lt.u32.totalorder %s3704_s19, %s4162_s0 }
  0x18   :  { %p3710_p10 = pnand %p3708_p9, %p3705_p8 }
  0x1a   :  { %3713 = shalt.err (!%p3710_p10)
}
  0x1b   :  { %s3714_s24 = scalar_lea.vmem %s3852_s27, 4096  ;;  %p3719_p12 = scmp.lt.s32.totalorder %s3852_s27, %s3852_s27 }
  0x1c   :  { %p3715_p11 = scmp.ne.s32.totalorder %s3852_s27, %s3714_s24  ;;  %p3720_p13 = scmp.lt.s32.totalorder %s3714_s24, %s3714_s24 }
  0x1e   :  { %p3721_p0 = por %p3720_p13, %p3719_p12 }
  0x20   :  { %p3722_p1 = pnand %p3721_p0, %p3715_p11 }
  0x22   :  { %3725 = shalt.err (!%p3722_p1)
}
  0x23   :  { %27 = dma.hbm_to_vmem [thread:$0]  %s4162_s0, 4096, %s3852_s27, [#allocation3], %s3802_s13, %s3802_s13, %s3803_s14  }
  0x24   :  { %s3804_s26 = smov [#allocation7]   ;;  %s3726_s8 = scalar_lea.hbm %s4165_s3, 24576 }
  0x25   :  { %s47_s28 = sshll.u32 %s3804_s26, 4  ;;  %p3727_p2 = scmp.ne.s32.totalorder %s4165_s3, %s3726_s8  ;;  %s48_s28 = int_to_ptr.vmem [resolvable:$true] %s47_s28 }
  0x26   :  { %p3730_p3 = scmp.lt.u32.totalorder %s3726_s8, %s4165_s3 }
  0x28   :  { %p3732_p4 = pnand %p3730_p3, %p3727_p2 }
  0x2a   :  { %3735 = shalt.err (!%p3732_p4)
}
  0x2b   :  { %s3736_s15 = scalar_lea.vmem %s48_s28, 24576  ;;  %p3741_p6 = scmp.lt.s32.totalorder %s48_s28, %s48_s28 }
  0x2c   :  { %p3737_p5 = scmp.ne.s32.totalorder %s48_s28, %s3736_s15  ;;  %p3742_p7 = scmp.lt.s32.totalorder %s3736_s15, %s3736_s15 }
  0x2e   :  { %p3743_p8 = por %p3742_p7, %p3741_p6 }
  0x30   :  { %p3744_p9 = pnand %p3743_p8, %p3737_p5 }
  0x32   :  { %3747 = shalt.err (!%p3744_p9)
}
  0x33   :  { %s3805_s0 = smov 384   ;;  %s3806_s27 = smov 24  }
  0x34   :  { %53 = dma.hbm_to_vmem [thread:$0]  %s4165_s3, 24576, %s48_s28, [#allocation6], %s3805_s0, %s3805_s0, %s3806_s27  }
  0x35   :  { %s3807_s18 = smov [#allocation8]   ;;  %s3748_s22 = scalar_lea.hbm %s4167_s5, 6144 }
  0x36   :  { %s61_s19 = sshll.u32 %s3807_s18, 4  ;;  %p3749_p10 = scmp.ne.s32.totalorder %s4167_s5, %s3748_s22  ;;  %s62_s19 = int_to_ptr.vmem [resolvable:$true] %s61_s19 }
  0x37   :  { %p3752_p11 = scmp.lt.u32.totalorder %s3748_s22, %s4167_s5 }
  0x39   :  { %p3754_p12 = pnand %p3752_p11, %p3749_p10 }
  0x3b   :  { %3757 = shalt.err (!%p3754_p12)
}
  0x3c   :  { %s3758_s26 = scalar_lea.vmem %s62_s19, 6144  ;;  %p3763_p0 = scmp.lt.s32.totalorder %s62_s19, %s62_s19 }
  0x3d   :  { %p3759_p13 = scmp.ne.s32.totalorder %s62_s19, %s3758_s26  ;;  %p3764_p1 = scmp.lt.s32.totalorder %s3758_s26, %s3758_s26 }
  0x3f   :  { %p3765_p2 = por %p3764_p1, %p3763_p0 }
  0x41   :  { %p3766_p3 = pnand %p3765_p2, %p3759_p13 }
  0x43   :  { %3769 = shalt.err (!%p3766_p3)
}
  0x44   :  { %67 = dma.hbm_to_vmem [thread:$0]  %s4167_s5, 6144, %s62_s19, [#allocation9], %s3802_s13, %s3802_s13, %s3803_s14  }
  0x45   :  { %3792 = dma.done.wait [#allocation3], 4096  }
  0x46   :  { %3793 = vsyncadd [#allocation3], 4294963200 }
  0x47   :  { %3794 = dma.done.wait [#allocation6], 25600  }
  0x48   :  { %3795 = vsyncadd [#allocation6], 4294941696 }
  0x49   :  { %3796 = dma.done.wait [#allocation9], 6144  }
  0x4a   :  { %3797 = vsyncadd [#allocation9], 4294961152  ;;  %v3808_v0 = vmov 0.0   ;;  %vm3809_vm0 = vmmov 0   ;;  %v3330_v1 = vld [vmem:[#allocation5] sm:$0xff]   ;;  %v3331_v2 = vld [vmem:[#allocation5 + $0x8] sm:$0xff]  }
  0x4b   :  { %3258 = vmatprep.subr.bf16.mxu1 %v3808_v0  ;;  %3238 = vmatprep.subr.bf16.mxu0 %v3808_v0  ;;  %v3332_v3 = vld [vmem:[#allocation5 + $0x10] sm:$0xff]   ;;  %v3333_v13 = vld [vmem:[#allocation5 + $0x18] sm:$0xff]   ;;  %v3334_v34 = vld [vmem:[#allocation5 + $0x20] sm:$0xff]   ;;  %s3811_s30 = smov [#allocation10]  }
  0x4c   :  { %3274 = vmatprep.mubr.msk.bf16.mxu1 %vm3809_vm0, %v3808_v0  ;;  %3254 = vmatprep.mubr.msk.bf16.mxu0 %vm3809_vm0, %v3808_v0  ;;  %v200_v4 = vld [vmem:[#allocation2 + $0x6c] sm:$0xff]   ;;  %v278_v18 = vld [vmem:[#allocation2 + $0x74] sm:$0xff]   ;;  %v3936_v53 = vld [vmem:[#allocation2 + $0x7c] sm:$0xff]   ;;  %s2875_s8 = sshll.u32 %s3811_s30, 4  ;;  %s2876_s8 = int_to_ptr.vmem [resolvable:$true] %s2875_s8 }
  0x4d   :  { %3259 = vmatpush3.bf16.msra.mxu1 %v3330_v1  ;;  %3239 = vmatpush3.bf16.msra.mxu0 %v3330_v1  ;;  %v204_v5 = vld [vmem:[#allocation2 + $0x8c] sm:$0xff]   ;;  %v201_v7 = vunpack.c.l.bf16 %v200_v4  ;;  %v240_v12 = vunpack.c.h.bf16 %v200_v4  ;;  %v282_v19 = vld [vmem:[#allocation2 + $0x94] sm:$0xff]   ;;  %v279_v33 = vunpack.c.l.bf16 %v278_v18  ;;  %v318_v51 = vunpack.c.h.bf16 %v278_v18  ;;  %v3940_v58 = vld [vmem:[#allocation2 + $0x8] ss:$148 sps:$4 sm:$0xff]   ;;  %p3775_p5 = scmp.lt.s32.totalorder %s2876_s8, %s2876_s8 }
  0x4e   :  { %3260 = vmatprep.subr.bf16.mxu1 %v3808_v0  ;;  %3240 = vmatprep.subr.bf16.mxu0 %v3808_v0  ;;  %v209_v6 = vld [vmem:[#allocation2 + $0xc] sm:$0xff]   ;;  %v205_v8 = vunpack.c.l.bf16 %v204_v5  ;;  %v244_v16 = vunpack.c.h.bf16 %v204_v5  ;;  %v287_v24 = vld [vmem:[#allocation2 + $0x14] sm:$0xff]   ;;  %v283_v36 = vunpack.c.l.bf16 %v282_v19  ;;  %v322_v52 = vunpack.c.h.bf16 %v282_v19  ;;  %v365_v59 = vld [vmem:[#allocation2 + $0x1c] sm:$0xff]  }
  0x4f   :  { %v210_v9 = vunpack.c.l.bf16 %v209_v6  ;;  %v214_v10 = vld [vmem:[#allocation2 + $0x2c] sm:$0xff]   ;;  %v249_v17 = vunpack.c.h.bf16 %v209_v6  ;;  %v202_v20 = vmax.f32 %v201_v7, 0.0  ;;  %v241_v23 = vmax.f32 %v240_v12, 0.0  ;;  %v292_v25 = vld [vmem:[#allocation2 + $0x34] sm:$0xff]   ;;  %v3943_v1 = vld [vmem:[#allocation2 + $0x3c] sm:$0xff]  }
  0x50   :  { %v219_v11 = vld [vmem:[#allocation2 + $0x4c] sm:$0xff]   ;;  %v215_v14 = vunpack.c.l.bf16 %v214_v10  ;;  %v206_v21 = vmax.f32 %v205_v8, 0.0  ;;  %v245_v28 = vmax.f32 %v244_v16, 0.0  ;;  %v254_v31 = vunpack.c.h.bf16 %v214_v10  ;;  %v297_v39 = vld [vmem:[#allocation2 + $0x54] sm:$0xff]   ;;  %v92_v16 = vld [vmem:[#allocation2] sm:$0xff]  }
  0x51   :  { %3261 = vmatpush3.bf16.msra.mxu1 %v3331_v2  ;;  %3241 = vmatpush3.bf16.msra.mxu0 %v3331_v2  ;;  %v220_v15 = vunpack.c.l.bf16 %v219_v11  ;;  %v211_v22 = vmax.f32 %v210_v9, 0.0  ;;  %v250_v29 = vmax.f32 %v249_v17, 0.0  ;;  %v259_v32 = vunpack.c.h.bf16 %v219_v11  ;;  %v3335_v44 = vld [vmem:[#allocation5 + $0x28] sm:$0xff]   ;;  %v375_v2 = vld [vmem:[#allocation2 + $0x5c] sm:$0xff]   ;;  %v3336_v11 = vld [vmem:[#allocation5 + $0x30] sm:$0xff]  }
  0x52   :  { %3262 = vmatprep.subr.bf16.mxu1 %v3808_v0  ;;  %3242 = vmatprep.subr.bf16.mxu0 %v3808_v0  ;;  %v216_v26 = vmax.f32 %v215_v14, 0.0  ;;  %v3928_v30 = vadd.f32 %v206_v21, %v202_v20  ;;  %v3930_v35 = vadd.f32 %v245_v28, %v241_v23  ;;  %v288_v37 = vunpack.c.l.bf16 %v287_v24  ;;  %v3337_v21 = vld [vmem:[#allocation5 + $0x38] sm:$0xff]  }
  0x53   :  { %v221_v27 = vmax.f32 %v220_v15, 0.0  ;;  %v293_v38 = vunpack.c.l.bf16 %v292_v25  ;;  %v255_v41 = vmax.f32 %v254_v31, 0.0  ;;  %v260_v42 = vmax.f32 %v259_v32, 0.0  ;;  %v126_v31 = vld [vmem:[#allocation2 + $0x84] sm:$0xff]  }
  0x54   :  { %v212_v40 = vadd.f32 %v211_v22, %v3928_v30  ;;  %v280_v43 = vmax.f32 %v279_v33, 0.0  ;;  %v251_v45 = vadd.f32 %v250_v29, %v3930_v35  ;;  %v284_v46 = vmax.f32 %v283_v36, 0.0  ;;  %v136_v32 = vld [vmem:[#allocation2 + $0x24] sm:$0xff]  }
  0x55   :  { %3263 = vmatpush3.bf16.msra.mxu1 %v3332_v3  ;;  %3243 = vmatpush3.bf16.msra.mxu0 %v3332_v3  ;;  %v289_v47 = vmax.f32 %v288_v37, 0.0  ;;  %v294_v48 = vmax.f32 %v293_v38, 0.0  ;;  %v298_v50 = vunpack.c.l.bf16 %v297_v39  ;;  %v327_v56 = vunpack.c.h.bf16 %v287_v24  ;;  %v3959_v33 = vld [vmem:[#allocation2 + $0x44] sm:$0xff]  }
  0x56   :  { %3264 = vmatprep.subr.bf16.mxu1 %v3808_v0  ;;  %3244 = vmatprep.subr.bf16.mxu0 %v3808_v0  ;;  %v217_v49 = vadd.f32 %v216_v26, %v212_v40  ;;  %v256_v54 = vadd.f32 %v255_v41, %v251_v45  ;;  %v3938_v55 = vadd.f32 %v284_v46, %v280_v43  ;;  %v332_v57 = vunpack.c.h.bf16 %v292_v25  ;;  %v122_v25 = vld [vmem:[#allocation2 + $0x64] sm:$0xff]  }
  0x57   :  { %v299_v61 = vmax.f32 %v298_v50, 0.0  ;;  %v319_v62 = vmax.f32 %v318_v51, 0.0  ;;  %v323_v63 = vmax.f32 %v322_v52, 0.0  ;;  %v328_v5 = vmax.f32 %v327_v56, 0.0 }
  0x58   :  { %v222_v60 = vadd.f32 %v221_v27, %v217_v49  ;;  %v261_v3 = vadd.f32 %v260_v42, %v256_v54  ;;  %v290_v4 = vadd.f32 %v289_v47, %v3938_v55  ;;  %v333_v6 = vmax.f32 %v332_v57, 0.0 }
  0x59   :  { %3265 = vmatpush3.bf16.msra.mxu1 %v3333_v13  ;;  %3245 = vmatpush3.bf16.msra.mxu0 %v3333_v13  ;;  %v3947_v7 = vadd.f32 %v323_v63, %v319_v62  ;;  %v337_v8 = vunpack.c.h.bf16 %v297_v39  ;;  %v357_v9 = vunpack.c.l.bf16 %v3936_v53  ;;  %v361_v10 = vunpack.c.h.bf16 %v3940_v58  ;;  %v3340_v39 = vld [vmem:[#allocation7 + $0x184] ss:$24 sps:$4 sm:$0xff]  }
  0x5a   :  { %3266 = vmatprep.subr.bf16.mxu1 %v3808_v0  ;;  %3246 = vmatprep.subr.bf16.mxu0 %v3808_v0  ;;  %v295_v12 = vadd.f32 %v294_v48, %v290_v4  ;;  %v366_v13 = vunpack.c.l.bf16 %v365_v59  ;;  %v371_v14 = vunpack.c.l.bf16 %v3943_v1  ;;  %v376_v15 = vunpack.c.l.bf16 %v375_v2 }
  0x5b   :  { %v329_v17 = vadd.f32 %v328_v5, %v3947_v7  ;;  %v338_v18 = vmax.f32 %v337_v8, 0.0  ;;  %v358_v19 = vmax.f32 %v357_v9, 0.0  ;;  %v362_v20 = vmax.f32 %v361_v10, 0.0 }
  0x5c   :  { %v300_v22 = vadd.f32 %v299_v61, %v295_v12  ;;  %v367_v23 = vmax.f32 %v366_v13, 0.0  ;;  %v372_v24 = vmax.f32 %v371_v14, 0.0  ;;  %v3957_v28 = vadd.f32 %v261_v3, %v222_v60  ;;  %v3341_v13 = vld [vmem:[#allocation7 + $0x188] ss:$24 sps:$4 sm:$0xff]  }
  0x5d   :  { %3267 = vmatpush3.bf16.msra.mxu1 %v3334_v34  ;;  %3247 = vmatpush3.bf16.msra.mxu0 %v3334_v34  ;;  %v334_v26 = vadd.f32 %v333_v6, %v329_v17  ;;  %v3955_v27 = vadd.f32 %v362_v20, %v358_v19  ;;  %v85_v29 = vunpack.c.h.bf16 %v375_v2  ;;  %v377_v34 = vmax.f32 %v376_v15, 0.0 }
  0x5e   :  { %3268 = vmatprep.subr.bf16.mxu1 %v3808_v0  ;;  %3248 = vmatprep.subr.bf16.mxu0 %v3808_v0  ;;  %v89_v36 = vunpack.c.h.bf16 %v3936_v53  ;;  %v93_v37 = vunpack.c.l.bf16 %v92_v16  ;;  %v98_v38 = vunpack.c.h.bf16 %v365_v59  ;;  %v398_v42 = vadd.f32 %v3957_v28, %v300_v22 }
  0x5f   :  { %v339_v40 = vadd.f32 %v338_v18, %v334_v26  ;;  %v368_v41 = vadd.f32 %v367_v23, %v3955_v27  ;;  %v86_v43 = vmax.f32 %v85_v29, 0.0  ;;  %v103_v48 = vunpack.c.h.bf16 %v3943_v1  ;;  %v3349_v18 = vld [vmem:[#allocation7 + $0x1bc] ss:$24 sps:$4 sm:$0xff]  }
  0x60   :  { %v90_v45 = vmax.f32 %v89_v36, 0.0  ;;  %v94_v46 = vmax.f32 %v93_v37, 0.0  ;;  %v99_v47 = vmax.f32 %v98_v38, 0.0  ;;  %v123_v51 = vunpack.c.l.bf16 %v122_v25  ;;  %v3361_v36 = vld [vmem:[#allocation7 + $0x21c] ss:$24 sps:$4 sm:$0xff]  }
  0x61   :  { %3269 = vmatpush3.bf16.msra.mxu1 %v3335_v44  ;;  %3249 = vmatpush3.bf16.msra.mxu0 %v3335_v44  ;;  %v3343_v44 = vld [vmem:[#allocation7 + $0x18c] ss:$24 sps:$4 sm:$0xff]   ;;  %v373_v49 = vadd.f32 %v372_v24, %v368_v41  ;;  %v399_v50 = vadd.f32 %v398_v42, %v339_v40  ;;  %v127_v52 = vunpack.c.l.bf16 %v126_v31  ;;  %v132_v54 = vunpack.c.h.bf16 %v92_v16  ;;  %v3338_v38 = vld [vmem:[#allocation7 + $0x180] ss:$24 sps:$4 sm:$0xff]  }
  0x62   :  { %3270 = vmatprep.subr.bf16.mxu1 %v3808_v0  ;;  %3250 = vmatprep.subr.bf16.mxu0 %v3808_v0  ;;  %v3967_v53 = vadd.f32 %v90_v45, %v86_v43  ;;  %v137_v56 = vunpack.c.l.bf16 %v136_v32  ;;  %v142_v57 = vunpack.c.l.bf16 %v3959_v33  ;;  %v124_v60 = vmax.f32 %v123_v51, 0.0  ;;  %v3346_v41 = vld [vmem:[#allocation7 + $0x1b4] ss:$24 sps:$4 sm:$0xff]   ;;  %v3344_v43 = vld [vmem:[#allocation7 + $0x1b0] ss:$24 sps:$4 sm:$0xff]  }
  0x63   :  { %v378_v59 = vadd.f32 %v377_v34, %v373_v49  ;;  %v128_v61 = vmax.f32 %v127_v52, 0.0  ;;  %v162_v62 = vunpack.c.h.bf16 %v122_v25  ;;  %v104_v1 = vmax.f32 %v103_v48, 0.0  ;;  %v3355_v25 = vld [vmem:[#allocation7 + $0x1ec] ss:$24 sps:$4 sm:$0xff]   ;;  %v3371_v48 = vld [vmem:[#allocation7 + $0x278] ss:$24 sps:$4 sm:$0xff]  }
  0x64   :  { %v95_v63 = vadd.f32 %v94_v46, %v3967_v53  ;;  %v133_v2 = vmax.f32 %v132_v54, 0.0  ;;  %v138_v3 = vmax.f32 %v137_v56, 0.0  ;;  %v166_v8 = vunpack.c.h.bf16 %v126_v31  ;;  %v3367_v42 = vld [vmem:[#allocation7 + $0x24c] ss:$24 sps:$4 sm:$0xff]   ;;  %v3373_v46 = vld [vmem:[#allocation7 + $0x27c] ss:$24 sps:$4 sm:$0xff]  }
  0x65   :  { %3271 = vmatpush3.bf16.msra.mxu1 %v3336_v11  ;;  %3251 = vmatpush3.bf16.msra.mxu0 %v3336_v11  ;;  %v400_v4 = vadd.f32 %v399_v50, %v378_v59  ;;  %v3971_v5 = vadd.f32 %v128_v61, %v124_v60  ;;  %v163_v6 = vmax.f32 %v162_v62, 0.0  ;;  %v143_v10 = vmax.f32 %v142_v57, 0.0  ;;  %v3352_v45 = vld [vmem:[#allocation7 + $0x1e4] ss:$24 sps:$4 sm:$0xff]   ;;  %v3358_v49 = vld [vmem:[#allocation7 + $0x214] ss:$24 sps:$4 sm:$0xff]  }
  0x66   :  { %3272 = vmatprep.subr.bf16.mxu1 %v3808_v0  ;;  %3252 = vmatprep.subr.bf16.mxu0 %v3808_v0  ;;  %v100_v9 = vadd.f32 %v99_v47, %v95_v63  ;;  %v171_v11 = vunpack.c.l.bf16 %v3940_v58  ;;  %v176_v12 = vunpack.c.h.bf16 %v136_v32  ;;  %v167_v16 = vmax.f32 %v166_v8, 0.0  ;;  %v3353_v32 = vld [vmem:[#allocation7 + $0x1e8] ss:$24 sps:$4 sm:$0xff]   ;;  %v3379_v50 = vld [vmem:[#allocation7 + $0x2ac] ss:$24 sps:$4 sm:$0xff]  }
  0x67   :  { %v570_v14 = vpack.c.bf16 %v400_v4, %v400_v4  ;;  %v134_v15 = vadd.f32 %v133_v2, %v3971_v5  ;;  %v181_v17 = vunpack.c.h.bf16 %v3959_v33  ;;  %v3350_v47 = vld [vmem:[#allocation7 + $0x1e0] ss:$24 sps:$4 sm:$0xff]   ;;  %v3356_v51 = vld [vmem:[#allocation7 + $0x210] ss:$24 sps:$4 sm:$0xff]   ;;  %v3364_v54 = vld [vmem:[#allocation7 + $0x244] ss:$24 sps:$4 sm:$0xff]  }
  0x68   :  { %v105_v19 = vadd.f32 %v104_v1, %v100_v9  ;;  %v172_v20 = vmax.f32 %v171_v11, 0.0  ;;  %v3976_v23 = vadd.f32 %v167_v16, %v163_v6  ;;  %v177_v24 = vmax.f32 %v176_v12, 0.0  ;;  %v3377_v52 = vld [vmem:[#allocation7 + $0x2a8] ss:$24 sps:$4 sm:$0xff]   ;;  %v3370_v57 = vld [vmem:[#allocation7 + $0x274] ss:$24 sps:$4 sm:$0xff]  }
  0x69   :  { %3273 = vmatpush3.bf16.msra.mxu1 %v3337_v21  ;;  %3253 = vmatpush3.bf16.msra.mxu0 %v3337_v21  ;;  %v3347_v21 = vld [vmem:[#allocation7 + $0x1b8] ss:$24 sps:$4 sm:$0xff]   ;;  %v139_v22 = vadd.f32 %v138_v3, %v134_v15  ;;  %v182_v31 = vmax.f32 %v181_v17, 0.0  ;;  %v3376_v60 = vld [vmem:[#allocation7 + $0x2a4] ss:$24 sps:$4 sm:$0xff]   ;;  %v3810_v6 = vmov 0  }
  0x6a   :  { %901 = vmatprep.subr.bf16.mxu0 %v3340_v39  ;;  %942 = vmatprep.subr.bf16.mxu1 %v3343_v44  ;;  %v395_v58 = vadd.f32 %v3957_v28, %v105_v19  ;;  %v173_v29 = vadd.f32 %v172_v20, %v3976_v23  ;;  %v3359_v39 = vld [vmem:[#allocation7 + $0x218] ss:$24 sps:$4 sm:$0xff]   ;;  %v3365_v44 = vld [vmem:[#allocation7 + $0x248] ss:$24 sps:$4 sm:$0xff]   ;;  %v3382_v62 = vld [vmem:[#allocation7 + $0x2d4] ss:$24 sps:$4 sm:$0xff]  }
  0x6b   :  { %v144_v26 = vadd.f32 %v143_v10, %v139_v22  ;;  %v3362_v56 = vld [vmem:[#allocation7 + $0x240] ss:$24 sps:$4 sm:$0xff]   ;;  %v3368_v59 = vld [vmem:[#allocation7 + $0x270] ss:$24 sps:$4 sm:$0xff]   ;;  %v3385_v63 = vld [vmem:[#allocation7 + $0x2dc] ss:$24 sps:$4 sm:$0xff]  }
  0x6c   :  { %3275 = vmatmul.mubr.bf16.vlgmr.msra.gmra.mrb[0].mxu1 %v570_v14  ;;  %v178_v33 = vadd.f32 %v177_v24, %v173_v29  ;;  %v3374_v61 = vld [vmem:[#allocation7 + $0x2a0] ss:$24 sps:$4 sm:$0xff]   ;;  %v3380_v1 = vld [vmem:[#allocation7 + $0x2d0] ss:$24 sps:$4 sm:$0xff]   ;;  %v3388_v3 = vld [vmem:[#allocation7 + $0x194] ss:$24 sps:$4 sm:$0xff]  }
  0x6d   :  { %943 = vmatpush1.bf16.msra.mxu1 %v3341_v13  ;;  %v396_v34 = vadd.f32 %v395_v58, %v144_v26  ;;  %v3383_v2 = vld [vmem:[#allocation7 + $0x2d8] ss:$24 sps:$4 sm:$0xff]   ;;  %v3391_v4 = vld [vmem:[#allocation7 + $0x4] ss:$24 sps:$4 sm:$0xff]   ;;  %974 = vmatprep.mubr.bf16.mxu1 %v3810_v6  ;;  %v3985_v8 = vld [vmem:[%s4164_s2] ss:$0 sm:$0xff] }
  0x6e   :  { %944 = vmatprep.subr.bf16.mxu1 %v3349_v18  ;;  %v183_v37 = vadd.f32 %v182_v31, %v178_v33  ;;  %v3386_v15 = vld [vmem:[#allocation7 + $0x190] ss:$24 sps:$4 sm:$0xff]   ;;  %v3389_v16 = vld [vmem:[#allocation7] ss:$24 sps:$4 sm:$0xff]   ;;  %v3394_v18 = vld [vmem:[#allocation7 + $0x1c4] ss:$24 sps:$4 sm:$0xff]  }
  0x6f   :  { %v3397_v19 = vld [vmem:[#allocation7 + $0x34] ss:$24 sps:$4 sm:$0xff]   ;;  %v3392_v20 = vld [vmem:[#allocation7 + $0x1c0] ss:$24 sps:$4 sm:$0xff]   ;;  %v3403_v24 = vld [vmem:[#allocation7 + $0x64] ss:$24 sps:$4 sm:$0xff]  }
  0x70   :  { %v397_v40 = vadd.f32 %v396_v34, %v183_v37  ;;  %v3400_v22 = vld [vmem:[#allocation7 + $0x1f4] ss:$24 sps:$4 sm:$0xff]   ;;  %v3401_v58 = vld [vmem:[#allocation7 + $0x60] ss:$24 sps:$4 sm:$0xff]   ;;  %v3406_v29 = vld [vmem:[#allocation7 + $0x224] ss:$24 sps:$4 sm:$0xff]  }
  0x71   :  { %945 = vmatpush1.bf16.msra.mxu1 %v3347_v21  ;;  %v3395_v21 = vld [vmem:[#allocation7 + $0x30] ss:$24 sps:$4 sm:$0xff]   ;;  %v3409_v31 = vld [vmem:[#allocation7 + $0x94] ss:$24 sps:$4 sm:$0xff]  }
  0x72   :  { %946 = vmatprep.subr.bf16.mxu1 %v3355_v25  ;;  %v408_v28 = vpack.c.bf16 %v397_v40, %v397_v40  ;;  %v3398_v25 = vld [vmem:[#allocation7 + $0x1f0] ss:$24 sps:$4 sm:$0xff]  }
  0x73   :  { %v3407_v37 = vld [vmem:[#allocation7 + $0x90] ss:$24 sps:$4 sm:$0xff]  }
  0x74   :  { %3255 = vmatmul.mubr.bf16.vlgmr.msra.gmra.mrb[0].mxu0 %v408_v28  ;;  %v3410_v40 = vld [vmem:[#allocation7 + $0x250] ss:$24 sps:$4 sm:$0xff]   ;;  %v3421_v28 = vld [vmem:[#allocation7 + $0xf4] ss:$24 sps:$4 sm:$0xff]  }
  0x75   :  { %947 = vmatpush1.bf16.msra.mxu1 %v3353_v32  ;;  %902 = vmatpush1.bf16.msra.mxu0 %v3338_v38  ;;  %v3412_v38 = vld [vmem:[#allocation7 + $0x254] ss:$24 sps:$4 sm:$0xff]  }
  0x76   :  { %948 = vmatprep.subr.bf16.mxu1 %v3361_v36  ;;  %903 = vmatprep.subr.bf16.mxu0 %v3346_v41  ;;  %v3404_v36 = vld [vmem:[#allocation7 + $0x220] ss:$24 sps:$4 sm:$0xff]  }
  0x77   :  { %933 = vmatprep.mubr.bf16.mxu0 %v3810_v6  ;;  %v3413_v41 = vld [vmem:[#allocation7 + $0xc0] ss:$24 sps:$4 sm:$0xff]  }
  0x79   :  { %949 = vmatpush1.bf16.msra.mxu1 %v3359_v39  ;;  %904 = vmatpush1.bf16.msra.mxu0 %v3344_v43  ;;  %v3415_v39 = vld [vmem:[#allocation7 + $0xc4] ss:$24 sps:$4 sm:$0xff]   ;;  %v3416_v43 = vld [vmem:[#allocation7 + $0x280] ss:$24 sps:$4 sm:$0xff]  }
  0x7a   :  { %950 = vmatprep.subr.bf16.mxu1 %v3367_v42  ;;  %905 = vmatprep.subr.bf16.mxu0 %v3352_v45  ;;  %v3418_v42 = vld [vmem:[#allocation7 + $0x284] ss:$24 sps:$4 sm:$0xff]   ;;  %v3424_v45 = vld [vmem:[#allocation7 + $0x2b4] ss:$24 sps:$4 sm:$0xff]  }
  0x7d   :  { %951 = vmatpush1.bf16.msra.mxu1 %v3365_v44  ;;  %906 = vmatpush1.bf16.msra.mxu0 %v3350_v47  ;;  %v3419_v44 = vld [vmem:[#allocation7 + $0xf0] ss:$24 sps:$4 sm:$0xff]  }
  0x7e   :  { %952 = vmatprep.subr.bf16.mxu1 %v3373_v46  ;;  %907 = vmatprep.subr.bf16.mxu0 %v3358_v49  ;;  %v3427_v46 = vld [vmem:[#allocation7 + $0x124] ss:$24 sps:$4 sm:$0xff]   ;;  %v3425_v49 = vld [vmem:[#allocation7 + $0x120] ss:$24 sps:$4 sm:$0xff]  }
  0x81   :  { %953 = vmatpush1.bf16.msra.mxu1 %v3371_v48  ;;  %908 = vmatpush1.bf16.msra.mxu0 %v3356_v51  ;;  %v3422_v48 = vld [vmem:[#allocation7 + $0x2b0] ss:$24 sps:$4 sm:$0xff]   ;;  %v3433_v51 = vld [vmem:[#allocation7 + $0x154] ss:$24 sps:$4 sm:$0xff]  }
  0x82   :  { %954 = vmatprep.subr.bf16.mxu1 %v3379_v50  ;;  %909 = vmatprep.subr.bf16.mxu0 %v3364_v54  ;;  %v3430_v50 = vld [vmem:[#allocation7 + $0x2e4] ss:$24 sps:$4 sm:$0xff]   ;;  %v3428_v54 = vld [vmem:[#allocation7 + $0x2e0] ss:$24 sps:$4 sm:$0xff]  }
  0x85   :  { %955 = vmatpush1.bf16.msra.mxu1 %v3377_v52  ;;  %910 = vmatpush1.bf16.msra.mxu0 %v3362_v56  ;;  %v3431_v56 = vld [vmem:[#allocation7 + $0x150] ss:$24 sps:$4 sm:$0xff]  }
  0x86   :  { %911 = vmatprep.subr.bf16.mxu0 %v3370_v57  ;;  %956 = vmatprep.subr.bf16.mxu1 %v3385_v63  ;;  %v3436_v57 = vld [vmem:[#allocation7 + $0xc] ss:$24 sps:$4 sm:$0xff]   ;;  %v3442_v63 = vld [vmem:[#allocation7 + $0x3c] ss:$24 sps:$4 sm:$0xff]  }
  0x89   :  { %912 = vmatpush1.bf16.msra.mxu0 %v3368_v59  ;;  %957 = vmatpush1.bf16.msra.mxu1 %v3383_v2  ;;  %v3439_v59 = vld [vmem:[#allocation7 + $0x14] ss:$24 sps:$4 sm:$0xff]   ;;  %v3440_v2 = vld [vmem:[#allocation7 + $0x38] ss:$24 sps:$4 sm:$0xff]  }
  0x8a   :  { %913 = vmatprep.subr.bf16.mxu0 %v3376_v60  ;;  %1264 = vmatprep.subr.bf16.mxu1 %v3391_v4  ;;  %v3448_v4 = vld [vmem:[#allocation7 + $0x6c] ss:$24 sps:$4 sm:$0xff]  }
  0x8d   :  { %914 = vmatpush1.bf16.msra.mxu0 %v3374_v61  ;;  %v3434_v61 = vld [vmem:[#allocation7 + $0x8] ss:$24 sps:$4 sm:$0xff]  }
  0x8e   :  { %915 = vmatprep.subr.bf16.mxu0 %v3382_v62  ;;  %v3437_v62 = vld [vmem:[#allocation7 + $0x10] ss:$24 sps:$4 sm:$0xff]  }
  0x91   :  { %916 = vmatpush1.bf16.msra.mxu0 %v3380_v1  ;;  %v3445_v1 = vld [vmem:[#allocation7 + $0x44] ss:$24 sps:$4 sm:$0xff]  }
  0x92   :  { %983 = vmatprep.subr.bf16.mxu0 %v3388_v3  ;;  %v3443_v3 = vld [vmem:[#allocation7 + $0x40] ss:$24 sps:$4 sm:$0xff]  }
 0x13f   :  { %v605_v9 = vpop.f32.mrb[0].mxu1 }
 0x140   :  { %v606_v10 = vadd.f32 %v3985_v8, %v605_v9  ;;  %v3276_v11 = vpop.f32.mrb[1].mxu1  ;;  %v3451_v9 = vld [vmem:[#allocation7 + $0x74] ss:$24 sps:$4 sm:$0xff]  }
 0x141   :  { %v608_v12 = vpop.f32.mrb[2].mxu1  ;;  %v3449_v11 = vld [vmem:[#allocation7 + $0x70] ss:$24 sps:$4 sm:$0xff]  }
 0x142   :  { %v611_v13 = vmax.f32 %v606_v10, 0.0  ;;  %v3277_v14 = vpop.f32.mrb[3].mxu1  ;;  %v3446_v10 = vld [vmem:[#allocation7 + $0x68] ss:$24 sps:$4 sm:$0xff]   ;;  %v3454_v12 = vld [vmem:[#allocation7 + $0x9c] ss:$24 sps:$4 sm:$0xff]  }
 0x143   :  { %v3452_v14 = vld [vmem:[#allocation7 + $0x98] ss:$24 sps:$4 sm:$0xff]  }
 0x144   :  { %v3988_v17 = vpack.c.bf16 %v611_v13, %v611_v13  ;;  %v3457_v13 = vld [vmem:[#allocation7 + $0xa4] ss:$24 sps:$4 sm:$0xff]  }
 0x146   :  { %934 = vmatmul.mubr.bf16.vlgmr.msra.gmra.mrb[4].mxu0 %v3988_v17  ;;  %975 = vmatmul.mubr.bf16.vlgmr.msra.gmra.mrb[4].mxu1 %v3988_v17 }
 0x147   :  { %984 = vmatpush1.bf16.msra.mxu0 %v3386_v15  ;;  %1265 = vmatpush1.bf16.msra.mxu1 %v3389_v16  ;;  %v514_v26 = vpop.f32.mrb[0].mxu0  ;;  %v3455_v15 = vld [vmem:[#allocation7 + $0xa0] ss:$24 sps:$4 sm:$0xff]   ;;  %v3460_v16 = vld [vmem:[#allocation7 + $0xcc] ss:$24 sps:$4 sm:$0xff]  }
 0x148   :  { %985 = vmatprep.subr.bf16.mxu0 %v3394_v18  ;;  %1266 = vmatprep.subr.bf16.mxu1 %v3397_v19  ;;  %v3256_v32 = vpop.f32.mrb[1].mxu0  ;;  %v515_v47 = vadd.f32 %v3985_v8, %v514_v26  ;;  %v3458_v18 = vld [vmem:[#allocation7 + $0xc8] ss:$24 sps:$4 sm:$0xff]  }
 0x149   :  { %1015 = vmatprep.mubr.bf16.mxu0 %v3810_v6  ;;  %1296 = vmatprep.mubr.bf16.mxu1 %v3810_v6  ;;  %v517_v33 = vpop.f32.mrb[2].mxu0  ;;  %v3461_v19 = vld [vmem:[#allocation7 + $0xd0] ss:$24 sps:$4 sm:$0xff]  }
 0x14a   :  { %v3257_v34 = vpop.f32.mrb[3].mxu0  ;;  %v520_v52 = vmax.f32 %v515_v47, 0.0  ;;  %v4001_v26 = vld [vmem:[#allocation2 + $0xa8] sm:$0xff]   ;;  %v4003_v32 = vld [vmem:[#allocation2 + $0xb0] sm:$0xff]  }
 0x14b   :  { %986 = vmatpush1.bf16.msra.mxu0 %v3392_v20  ;;  %1267 = vmatpush1.bf16.msra.mxu1 %v3395_v21  ;;  %v3466_v20 = vld [vmem:[#allocation7 + $0xfc] ss:$24 sps:$4 sm:$0xff]  }
 0x14c   :  { %987 = vmatprep.subr.bf16.mxu0 %v3400_v22  ;;  %1268 = vmatprep.subr.bf16.mxu1 %v3403_v24  ;;  %v3995_v60 = vpack.c.bf16 %v520_v52, %v520_v52  ;;  %v3469_v21 = vld [vmem:[#allocation7 + $0x104] ss:$24 sps:$4 sm:$0xff]   ;;  %v3464_v22 = vld [vmem:[#allocation7 + $0xf8] ss:$24 sps:$4 sm:$0xff]  }
 0x14d   :  { %v3467_v24 = vld [vmem:[#allocation7 + $0x100] ss:$24 sps:$4 sm:$0xff]   ;;  %v3478_v33 = vld [vmem:[#allocation7 + $0x15c] ss:$24 sps:$4 sm:$0xff]  }
 0x14e   :  { %v3481_v34 = vld [vmem:[#allocation7 + $0x164] ss:$24 sps:$4 sm:$0xff]  }
 0x14f   :  { %988 = vmatpush1.bf16.msra.mxu0 %v3398_v25  ;;  %1269 = vmatpush1.bf16.msra.mxu1 %v3401_v58  ;;  %v3472_v25 = vld [vmem:[#allocation7 + $0x12c] ss:$24 sps:$4 sm:$0xff]  }
 0x150   :  { %989 = vmatprep.subr.bf16.mxu0 %v3406_v29  ;;  %1270 = vmatprep.subr.bf16.mxu1 %v3409_v31  ;;  %v3475_v58 = vld [vmem:[#allocation7 + $0x134] ss:$24 sps:$4 sm:$0xff]   ;;  %v3470_v29 = vld [vmem:[#allocation7 + $0x128] ss:$24 sps:$4 sm:$0xff]  }
 0x151   :  { %v3473_v31 = vld [vmem:[#allocation7 + $0x130] ss:$24 sps:$4 sm:$0xff]  }
 0x153   :  { %990 = vmatpush1.bf16.msra.mxu0 %v3404_v36  ;;  %1271 = vmatpush1.bf16.msra.mxu1 %v3407_v37  ;;  %v107_v36 = vld [vmem:[#allocation2 + $0xa0] sm:$0xff]   ;;  %v225_v37 = vunpack.c.h.bf16 %v4001_v26 }
 0x154   :  { %991 = vmatprep.subr.bf16.mxu0 %v3412_v38  ;;  %1272 = vmatprep.subr.bf16.mxu1 %v3415_v39  ;;  %v4006_v38 = vld [vmem:[#allocation2 + $0xc8] sm:$0xff]   ;;  %v264_v39 = vunpack.c.l.bf16 %v4003_v32  ;;  %v147_v52 = vunpack.c.h.bf16 %v107_v36 }
 0x157   :  { %992 = vmatpush1.bf16.msra.mxu0 %v3410_v40  ;;  %1273 = vmatpush1.bf16.msra.mxu1 %v3413_v41  ;;  %v3476_v40 = vld [vmem:[#allocation7 + $0x158] ss:$24 sps:$4 sm:$0xff]  }
 0x158   :  { %993 = vmatprep.subr.bf16.mxu0 %v3418_v42  ;;  %1274 = vmatprep.subr.bf16.mxu1 %v3421_v28  ;;  %v3479_v41 = vld [vmem:[#allocation7 + $0x160] ss:$24 sps:$4 sm:$0xff]   ;;  %v4009_v42 = vld [vmem:[#allocation2 + $0xd0] sm:$0xff]   ;;  %v108_v28 = vunpack.c.l.bf16 %v107_v36 }
 0x159   :  { %v269_v47 = vunpack.c.l.bf16 %v4009_v42 }
 0x15b   :  { %994 = vmatpush1.bf16.msra.mxu0 %v3416_v43  ;;  %1275 = vmatpush1.bf16.msra.mxu1 %v3419_v44  ;;  %v112_v43 = vld [vmem:[#allocation2 + $0xc0] sm:$0xff]   ;;  %v226_v44 = vmax.f32 %v225_v37, 0.0 }
 0x15c   :  { %995 = vmatprep.subr.bf16.mxu0 %v3424_v45  ;;  %1276 = vmatprep.subr.bf16.mxu1 %v3427_v46  ;;  %v230_v45 = vunpack.c.h.bf16 %v4006_v38  ;;  %v265_v46 = vmax.f32 %v264_v39, 0.0  ;;  %v4048_v39 = vld [vmem:[#allocation5 + $0x20] sm:$0xff]  }
 0x15f   :  { %996 = vmatpush1.bf16.msra.mxu0 %v3422_v48  ;;  %1277 = vmatpush1.bf16.msra.mxu1 %v3425_v49  ;;  %v195_v48 = vld [vmem:[#allocation2 + $0xe8] sm:$0xff]   ;;  %v4013_v49 = vld [vmem:[#allocation2 + $0xf0] sm:$0xff]  }
 0x160   :  { %997 = vmatprep.subr.bf16.mxu0 %v3430_v50  ;;  %1278 = vmatprep.subr.bf16.mxu1 %v3433_v51  ;;  %v109_v50 = vmax.f32 %v108_v28, 0.0  ;;  %v113_v51 = vunpack.c.l.bf16 %v112_v43 }
 0x163   :  { %998 = vmatpush1.bf16.msra.mxu0 %v3428_v54  ;;  %1279 = vmatpush1.bf16.msra.mxu1 %v3431_v56  ;;  %v227_v54 = vadd.f32 %v226_v44, %v3928_v30  ;;  %v231_v56 = vmax.f32 %v230_v45, 0.0  ;;  %v110_v30 = vadd.f32 %v109_v50, %v3967_v53  ;;  %v4060_v45 = vld [vmem:[#allocation5 + $0x38] sm:$0xff]   ;;  %v3487_v50 = vld [vmem:[#allocation7 + $0x30c] ss:$24 sps:$4 sm:$0xff]  }
 0x164   :  { %1305 = vmatprep.subr.bf16.mxu0 %v3436_v57  ;;  %1346 = vmatprep.subr.bf16.mxu1 %v3439_v59  ;;  %v117_v57 = vld [vmem:[#allocation2 + $0xe0] sm:$0xff]   ;;  %v235_v59 = vunpack.c.h.bf16 %v195_v48 }
 0x166   :  { %1016 = vmatmul.mubr.bf16.vlgmr.msra.gmra.mrb[8].mxu0 %v3988_v17  ;;  %1297 = vmatmul.mubr.bf16.vlgmr.msra.gmra.mrb[8].mxu1 %v3995_v60  ;;  %v3463_v17 = vld [vmem:[#allocation7 + $0xd4] ss:$24 sps:$4 sm:$0xff]  }
 0x167   :  { %1306 = vmatpush1.bf16.msra.mxu0 %v3434_v61  ;;  %1347 = vmatpush1.bf16.msra.mxu1 %v3437_v62  ;;  %v266_v61 = vadd.f32 %v265_v46, %v3930_v35  ;;  %v270_v62 = vmax.f32 %v269_v47, 0.0  ;;  %v152_v35 = vunpack.c.h.bf16 %v112_v43  ;;  %v4056_v43 = vld [vmem:[#allocation5 + $0x30] sm:$0xff]   ;;  %v3482_v46 = vld [vmem:[#allocation7 + $0x300] ss:$24 sps:$4 sm:$0xff]   ;;  %v3484_v47 = vld [vmem:[#allocation7 + $0x304] ss:$24 sps:$4 sm:$0xff]  }
 0x168   :  { %1307 = vmatprep.subr.bf16.mxu0 %v3442_v63  ;;  %1348 = vmatprep.subr.bf16.mxu1 %v3445_v1  ;;  %v274_v63 = vunpack.c.l.bf16 %v4013_v49  ;;  %v4021_v1 = vld [vmem:[#allocation5] sm:$0xff]  }
 0x169   :  { %1337 = vmatprep.mubr.bf16.mxu0 %v3810_v6  ;;  %1378 = vmatprep.mubr.bf16.mxu1 %v3810_v6 }
 0x16b   :  { %1308 = vmatpush1.bf16.msra.mxu0 %v3440_v2  ;;  %1349 = vmatpush1.bf16.msra.mxu1 %v3443_v3  ;;  %v114_v2 = vmax.f32 %v113_v51, 0.0  ;;  %v148_v3 = vmax.f32 %v147_v52, 0.0  ;;  %v3490_v51 = vld [vmem:[#allocation7 + $0x334] ss:$24 sps:$4 sm:$0xff]  }
 0x16c   :  { %1309 = vmatprep.subr.bf16.mxu0 %v3448_v4  ;;  %1350 = vmatprep.subr.bf16.mxu1 %v3451_v9  ;;  %v186_v4 = vunpack.c.l.bf16 %v4001_v26  ;;  %v232_v9 = vadd.f32 %v231_v56, %v227_v54  ;;  %v3493_v52 = vld [vmem:[#allocation7 + $0x33c] ss:$24 sps:$4 sm:$0xff]   ;;  %v3488_v54 = vld [vmem:[#allocation7 + $0x330] ss:$24 sps:$4 sm:$0xff]  }
 0x16d   :  { %v3491_v56 = vld [vmem:[#allocation7 + $0x338] ss:$24 sps:$4 sm:$0xff]  }
 0x16f   :  { %1310 = vmatpush1.bf16.msra.mxu0 %v3446_v10  ;;  %1351 = vmatpush1.bf16.msra.mxu1 %v3449_v11  ;;  %v236_v10 = vmax.f32 %v235_v59, 0.0  ;;  %v271_v11 = vadd.f32 %v270_v62, %v266_v61  ;;  %v3499_v59 = vld [vmem:[#allocation7 + $0x36c] ss:$24 sps:$4 sm:$0xff]   ;;  %v3494_v61 = vld [vmem:[#allocation7 + $0x360] ss:$24 sps:$4 sm:$0xff]  }
 0x170   :  { %1311 = vmatprep.subr.bf16.mxu0 %v3454_v12  ;;  %1352 = vmatprep.subr.bf16.mxu1 %v3457_v13  ;;  %v275_v12 = vmax.f32 %v274_v63, 0.0  ;;  %v4030_v13 = vld [vmem:[#allocation5 + $0x8] sm:$0xff]  }
 0x171   :  { %v3497_v62 = vld [vmem:[#allocation7 + $0x368] ss:$24 sps:$4 sm:$0xff]   ;;  %v3502_v63 = vld [vmem:[#allocation7 + $0x394] ss:$24 sps:$4 sm:$0xff]  }
 0x173   :  { %1312 = vmatpush1.bf16.msra.mxu0 %v3452_v14  ;;  %1353 = vmatpush1.bf16.msra.mxu1 %v3455_v15  ;;  %v115_v14 = vadd.f32 %v114_v2, %v110_v30  ;;  %v149_v15 = vadd.f32 %v148_v3, %v3971_v5  ;;  %v3505_v30 = vld [vmem:[#allocation7 + $0x39c] ss:$24 sps:$4 sm:$0xff]   ;;  %v3500_v2 = vld [vmem:[#allocation7 + $0x390] ss:$24 sps:$4 sm:$0xff]  }
 0x174   :  { %1313 = vmatprep.subr.bf16.mxu0 %v3460_v16  ;;  %1354 = vmatprep.subr.bf16.mxu1 %v3463_v17  ;;  %v153_v16 = vmax.f32 %v152_v35, 0.0  ;;  %v157_v17 = vunpack.c.h.bf16 %v117_v57  ;;  %v3508_v3 = vld [vmem:[#allocation7 + $0x3c4] ss:$24 sps:$4 sm:$0xff]  }
 0x175   :  { %v3511_v35 = vld [vmem:[#allocation7 + $0x3cc] ss:$24 sps:$4 sm:$0xff]  }
 0x176   :  { %v154_v26 = vadd.f32 %v153_v16, %v149_v15  ;;  %v3523_v15 = vld [vmem:[#allocation7 + $0x42c] ss:$24 sps:$4 sm:$0xff]   ;;  %v3518_v16 = vld [vmem:[#allocation7 + $0x420] ss:$24 sps:$4 sm:$0xff]  }
 0x177   :  { %1314 = vmatpush1.bf16.msra.mxu0 %v3458_v18  ;;  %1355 = vmatpush1.bf16.msra.mxu1 %v3461_v19  ;;  %v187_v18 = vmax.f32 %v186_v4, 0.0  ;;  %v191_v19 = vunpack.c.l.bf16 %v4006_v38  ;;  %v3506_v4 = vld [vmem:[#allocation7 + $0x3c0] ss:$24 sps:$4 sm:$0xff]  }
 0x178   :  { %1315 = vmatprep.subr.bf16.mxu0 %v3466_v20  ;;  %1356 = vmatprep.subr.bf16.mxu1 %v3469_v21  ;;  %v237_v20 = vadd.f32 %v236_v10, %v232_v9  ;;  %v276_v21 = vadd.f32 %v275_v12, %v271_v11  ;;  %v3509_v9 = vld [vmem:[#allocation7 + $0x3c8] ss:$24 sps:$4 sm:$0xff]   ;;  %v3514_v10 = vld [vmem:[#allocation7 + $0x3f4] ss:$24 sps:$4 sm:$0xff]  }
 0x179   :  { %v192_v5 = vmax.f32 %v191_v19, 0.0  ;;  %v3517_v11 = vld [vmem:[#allocation7 + $0x3fc] ss:$24 sps:$4 sm:$0xff]   ;;  %v3512_v12 = vld [vmem:[#allocation7 + $0x3f0] ss:$24 sps:$4 sm:$0xff]  }
 0x17a   :  { %v3529_v19 = vld [vmem:[#allocation7 + $0x45c] ss:$24 sps:$4 sm:$0xff]  }
 0x17b   :  { %1316 = vmatpush1.bf16.msra.mxu0 %v3464_v22  ;;  %1357 = vmatpush1.bf16.msra.mxu1 %v3467_v24  ;;  %v4036_v22 = vld [vmem:[#allocation5 + $0x10] sm:$0xff]  }
 0x17c   :  { %1317 = vmatprep.subr.bf16.mxu0 %v3472_v25  ;;  %1358 = vmatprep.subr.bf16.mxu1 %v3475_v58  ;;  %v158_v25 = vmax.f32 %v157_v17, 0.0  ;;  %v196_v58 = vunpack.c.l.bf16 %v195_v48  ;;  %v3485_v48 = vld [vmem:[#allocation7 + $0x308] ss:$24 sps:$4 sm:$0xff]  }
 0x17d   :  { %v3521_v17 = vld [vmem:[#allocation7 + $0x428] ss:$24 sps:$4 sm:$0xff]  }
 0x17e   :  { %v197_v37 = vmax.f32 %v196_v58, 0.0 }
 0x17f   :  { %1318 = vmatpush1.bf16.msra.mxu0 %v3470_v29  ;;  %1359 = vmatpush1.bf16.msra.mxu1 %v3473_v31  ;;  %v188_v29 = vadd.f32 %v187_v18, %v3976_v23  ;;  %v4041_v31 = vadd.f32 %v276_v21, %v237_v20  ;;  %v3526_v18 = vld [vmem:[#allocation7 + $0x454] ss:$24 sps:$4 sm:$0xff]   ;;  %v3524_v20 = vld [vmem:[#allocation7 + $0x450] ss:$24 sps:$4 sm:$0xff]  }
 0x180   :  { %1319 = vmatprep.subr.bf16.mxu0 %v3478_v33  ;;  %1360 = vmatprep.subr.bf16.mxu1 %v3481_v34  ;;  %v4043_v33 = vld [vmem:[#allocation5 + $0x18] sm:$0xff]   ;;  %v159_v34 = vadd.f32 %v158_v25, %v154_v26 }
 0x181   :  { %v193_v36 = vadd.f32 %v192_v5, %v188_v29  ;;  %v3527_v21 = vld [vmem:[#allocation7 + $0x458] ss:$24 sps:$4 sm:$0xff]  }
 0x183   :  { %1320 = vmatpush1.bf16.msra.mxu0 %v3476_v40  ;;  %1361 = vmatpush1.bf16.msra.mxu1 %v3479_v41  ;;  %v198_v23 = vadd.f32 %v197_v37, %v193_v36  ;;  %v4052_v41 = vld [vmem:[#allocation5 + $0x28] sm:$0xff]  }
 0x184   :  { %3278 = vmatprep.subr.bf16.mxu0 %v3808_v0  ;;  %1718 = vmatprep.subr.bf16.mxu1 %v3484_v47 }
 0x186   :  { %1338 = vmatmul.mubr.bf16.vlgmr.msra.gmra.mrb[12].mxu0 %v3995_v60  ;;  %1379 = vmatmul.mubr.bf16.vlgmr.msra.gmra.mrb[12].mxu1 %v3995_v60  ;;  %v118_v60 = vunpack.c.l.bf16 %v117_v57  ;;  %v3496_v57 = vld [vmem:[#allocation7 + $0x364] ss:$24 sps:$4 sm:$0xff]  }
 0x187   :  { %3279 = vmatpush3.bf16.msra.mxu0 %v4021_v1  ;;  %3294 = vmatprep.mubr.msk.bf16.mxu0 %vm3809_vm0, %v3808_v0 }
 0x188   :  { %3280 = vmatprep.subr.bf16.mxu0 %v3808_v0  ;;  %1750 = vmatprep.mubr.bf16.mxu1 %v3810_v6  ;;  %v119_v53 = vmax.f32 %v118_v60, 0.0  ;;  %v3503_v60 = vld [vmem:[#allocation7 + $0x398] ss:$24 sps:$4 sm:$0xff]  }
 0x189   :  { %1719 = vmatpush1.bf16.msra.mxu1 %v3482_v46 }
 0x18a   :  { %v120_v24 = vadd.f32 %v119_v53, %v115_v14  ;;  %1720 = vmatprep.subr.bf16.mxu1 %v3490_v51  ;;  %v3515_v14 = vld [vmem:[#allocation7 + $0x3f8] ss:$24 sps:$4 sm:$0xff]   ;;  %v3520_v53 = vld [vmem:[#allocation7 + $0x424] ss:$24 sps:$4 sm:$0xff]  }
 0x18b   :  { %3281 = vmatpush3.bf16.msra.mxu0 %v4030_v13 }
 0x18c   :  { %3282 = vmatprep.subr.bf16.mxu0 %v3808_v0  ;;  %v402_v38 = vadd.f32 %v4041_v31, %v120_v24  ;;  %v3532_v24 = vld [vmem:[#allocation7 + $0x314] ss:$24 sps:$4 sm:$0xff]  }
 0x18d   :  { %1721 = vmatpush1.bf16.msra.mxu1 %v3488_v54 }
 0x18e   :  { %v403_v40 = vadd.f32 %v402_v38, %v159_v34  ;;  %1722 = vmatprep.subr.bf16.mxu1 %v3496_v57 }
 0x18f   :  { %3283 = vmatpush3.bf16.msra.mxu0 %v4036_v22 }
 0x190   :  { %3284 = vmatprep.subr.bf16.mxu0 %v3808_v0  ;;  %v404_v28 = vadd.f32 %v403_v40, %v198_v23 }
 0x191   :  { %1723 = vmatpush1.bf16.msra.mxu1 %v3494_v61 }
 0x192   :  { %v1387_v44 = vpack.c.bf16 %v404_v28, %v404_v28  ;;  %1724 = vmatprep.subr.bf16.mxu1 %v3502_v63 }
 0x193   :  { %3285 = vmatpush3.bf16.msra.mxu0 %v4043_v33 }
 0x194   :  { %3286 = vmatprep.subr.bf16.mxu0 %v3808_v0 }
 0x195   :  { %1725 = vmatpush1.bf16.msra.mxu1 %v3500_v2 }
 0x196   :  { %1726 = vmatprep.subr.bf16.mxu1 %v3508_v3 }
 0x197   :  { %3287 = vmatpush3.bf16.msra.mxu0 %v4048_v39 }
 0x198   :  { %3288 = vmatprep.subr.bf16.mxu0 %v3808_v0 }
 0x199   :  { %1727 = vmatpush1.bf16.msra.mxu1 %v3506_v4 }
 0x19a   :  { %1728 = vmatprep.subr.bf16.mxu1 %v3514_v10 }
 0x19b   :  { %3289 = vmatpush3.bf16.msra.mxu0 %v4052_v41 }
 0x19c   :  { %3290 = vmatprep.subr.bf16.mxu0 %v3808_v0 }
 0x19d   :  { %1729 = vmatpush1.bf16.msra.mxu1 %v3512_v12 }
 0x19e   :  { %1730 = vmatprep.subr.bf16.mxu1 %v3520_v53  ;;  %v3530_v53 = vld [vmem:[#allocation7 + $0x310] ss:$24 sps:$4 sm:$0xff]  }
 0x19f   :  { %3291 = vmatpush3.bf16.msra.mxu0 %v4056_v43 }
 0x1a0   :  { %3292 = vmatprep.subr.bf16.mxu0 %v3808_v0 }
 0x1a1   :  { %1731 = vmatpush1.bf16.msra.mxu1 %v3518_v16 }
 0x1a2   :  { %1732 = vmatprep.subr.bf16.mxu1 %v3526_v18 }
 0x1a3   :  { %3293 = vmatpush3.bf16.msra.mxu0 %v4060_v45 }
 0x1a4   :  { %1759 = vmatprep.subr.bf16.mxu0 %v3487_v50 }
 0x1a5   :  { %1733 = vmatpush1.bf16.msra.mxu1 %v3524_v20 }
 0x1a6   :  { %3295 = vmatmul.mubr.bf16.vlgmr.msra.gmra.mrb[16].mxu0 %v1387_v44  ;;  %1800 = vmatprep.subr.bf16.mxu1 %v3532_v24  ;;  %v3538_v24 = vld [vmem:[#allocation7 + $0x374] ss:$24 sps:$4 sm:$0xff]  }
 0x1a7   :  { %1791 = vmatprep.mubr.bf16.mxu0 %v3810_v6  ;;  %1760 = vmatpush1.bf16.msra.mxu0 %v3485_v48 }
 0x1a8   :  { %1761 = vmatprep.subr.bf16.mxu0 %v3493_v52 }
 0x1ab   :  { %1762 = vmatpush1.bf16.msra.mxu0 %v3491_v56 }
 0x1ac   :  { %1763 = vmatprep.subr.bf16.mxu0 %v3499_v59 }
 0x1af   :  { %1764 = vmatpush1.bf16.msra.mxu0 %v3497_v62 }
 0x1b0   :  { %1765 = vmatprep.subr.bf16.mxu0 %v3505_v30 }
 0x1b3   :  { %1766 = vmatpush1.bf16.msra.mxu0 %v3503_v60 }
 0x1b4   :  { %1767 = vmatprep.subr.bf16.mxu0 %v3511_v35 }
 0x1b7   :  { %1768 = vmatpush1.bf16.msra.mxu0 %v3509_v9 }
 0x1b8   :  { %1769 = vmatprep.subr.bf16.mxu0 %v3517_v11  ;;  %v303_v11 = vunpack.c.h.bf16 %v4003_v32  ;;  %v346_v32 = vld [vmem:[#allocation2 + $0xd8] sm:$0xff]  }
 0x1ba   :  { %v304_v18 = vmax.f32 %v303_v11, 0.0  ;;  %v3556_v11 = vld [vmem:[#allocation7 + $0x484] ss:$24 sps:$4 sm:$0xff]  }
 0x1bb   :  { %1770 = vmatpush1.bf16.msra.mxu0 %v3515_v14 }
 0x1bc   :  { %1771 = vmatprep.subr.bf16.mxu0 %v3523_v15  ;;  %v341_v15 = vld [vmem:[#allocation2 + $0xb8] sm:$0xff]  }
 0x1bd   :  { %v342_v20 = vunpack.c.l.bf16 %v341_v15 }
 0x1bf   :  { %1772 = vmatpush1.bf16.msra.mxu0 %v3521_v17  ;;  %v3535_v17 = vld [vmem:[#allocation7 + $0x344] ss:$24 sps:$4 sm:$0xff]  }
 0x1c0   :  { %1773 = vmatprep.subr.bf16.mxu0 %v3529_v19  ;;  %v308_v19 = vunpack.c.h.bf16 %v4009_v42  ;;  %v305_v42 = vadd.f32 %v304_v18, %v3938_v55  ;;  %v3569_v18 = vld [vmem:[#allocation7 + $0x4e8] ss:$24 sps:$4 sm:$0xff]  }
 0x1c3   :  { %1774 = vmatpush1.bf16.msra.mxu0 %v3527_v21  ;;  %v3533_v21 = vld [vmem:[#allocation7 + $0x340] ss:$24 sps:$4 sm:$0xff]  }
 0x1c4   :  { %3298 = vmatprep.subr.bf16.mxu0 %v3808_v0 }
 0x219   :  { %v935_v25 = vpop.f32.mrb[4].mxu0  ;;  %v976_v58 = vpop.f32.mrb[4].mxu1 }
 0x21a   :  { %v937_v26 = vpop.f32.mrb[5].mxu0  ;;  %v978_v29 = vpop.f32.mrb[5].mxu1 }
 0x21b   :  { %v939_v5 = vpop.f32.mrb[6].mxu0  ;;  %v980_v34 = vpop.f32.mrb[6].mxu1 }
 0x21c   :  { %v940_v36 = vpop.f32.mrb[7].mxu0  ;;  %v981_v37 = vpop.f32.mrb[7].mxu1  ;;  %v351_v5 = vld [vmem:[#allocation2 + $0xf8] sm:$0xff]   ;;  %v3536_v34 = vld [vmem:[#allocation7 + $0x370] ss:$24 sps:$4 sm:$0xff]  }
 0x21d   :  { %v3541_v36 = vld [vmem:[#allocation7 + $0x3a4] ss:$24 sps:$4 sm:$0xff]  }
 0x239   :  { %v1017_v38 = vpop.f32.mrb[8].mxu0  ;;  %v1298_v23 = vpop.f32.mrb[8].mxu1 }
 0x23a   :  { %v4065_v40 = vadd.f32 %v1298_v23, %v935_v25  ;;  %v1019_v28 = vpop.f32.mrb[9].mxu0  ;;  %v1300_v44 = vpop.f32.mrb[9].mxu1  ;;  %v309_v25 = vmax.f32 %v308_v19, 0.0  ;;  %v352_v23 = vunpack.c.l.bf16 %v351_v5  ;;  %v3574_v19 = vld [vmem:[#allocation7 + $0x514] ss:$24 sps:$4 sm:$0xff]  }
 0x23b   :  { %v4067_v46 = vadd.f32 %v1300_v44, %v937_v26  ;;  %v1021_v47 = vpop.f32.mrb[10].mxu0  ;;  %v1302_v48 = vpop.f32.mrb[10].mxu1  ;;  %v343_v26 = vmax.f32 %v342_v20, 0.0  ;;  %v3577_v20 = vld [vmem:[#allocation7 + $0x51c] ss:$24 sps:$4 sm:$0xff]  }
 0x23c   :  { %v1022_v50 = vpop.f32.mrb[11].mxu0  ;;  %v1303_v51 = vpop.f32.mrb[11].mxu1  ;;  %v310_v37 = vadd.f32 %v309_v25, %v305_v42  ;;  %v3539_v47 = vld [vmem:[#allocation7 + $0x3a0] ss:$24 sps:$4 sm:$0xff]   ;;  %v3583_v42 = vld [vmem:[#allocation7 + $0x54c] ss:$24 sps:$4 sm:$0xff]  }
 0x23d   :  { %v344_v55 = vadd.f32 %v343_v26, %v3947_v7  ;;  %v353_v50 = vmax.f32 %v352_v23, 0.0  ;;  %v3542_v7 = vld [vmem:[#allocation7 + $0x3d0] ss:$24 sps:$4 sm:$0xff]   ;;  %v3578_v25 = vld [vmem:[#allocation7 + $0x540] ss:$24 sps:$4 sm:$0xff]  }
 0x23e   :  { %v3586_v26 = vld [vmem:[#allocation7 + $0x574] ss:$24 sps:$4 sm:$0xff]  }
 0x23f   :  { %v3598_v23 = vld [vmem:[#allocation7 + $0x5d4] ss:$24 sps:$4 sm:$0xff]  }
 0x259   :  { %v1339_v52 = vpop.f32.mrb[12].mxu0  ;;  %v1380_v54 = vpop.f32.mrb[12].mxu1 }
 0x25a   :  { %v4069_v56 = vadd.f32 %v1339_v52, %v976_v58  ;;  %v4071_v57 = vadd.f32 %v1380_v54, %v1017_v38  ;;  %v1341_v59 = vpop.f32.mrb[13].mxu0  ;;  %v1382_v61 = vpop.f32.mrb[13].mxu1  ;;  %v313_v58 = vunpack.c.h.bf16 %v4013_v49  ;;  %v386_v49 = vunpack.c.h.bf16 %v346_v32 }
 0x25b   :  { %v4073_v62 = vadd.f32 %v1341_v59, %v978_v29  ;;  %v4075_v63 = vadd.f32 %v1382_v61, %v1019_v28  ;;  %v1343_v30 = vpop.f32.mrb[14].mxu0  ;;  %v1384_v2 = vpop.f32.mrb[14].mxu1  ;;  %v347_v29 = vunpack.c.l.bf16 %v346_v32  ;;  %v391_v59 = vunpack.c.h.bf16 %v351_v5  ;;  %v3575_v32 = vld [vmem:[#allocation7 + $0x518] ss:$24 sps:$4 sm:$0xff]  }
 0x25c   :  { %v1344_v60 = vpop.f32.mrb[15].mxu0  ;;  %v1385_v3 = vpop.f32.mrb[15].mxu1  ;;  %v314_v38 = vmax.f32 %v313_v58, 0.0  ;;  %v387_v54 = vmax.f32 %v386_v49, 0.0  ;;  %v3581_v58 = vld [vmem:[#allocation7 + $0x548] ss:$24 sps:$4 sm:$0xff]  }
 0x25d   :  { %v348_v28 = vmax.f32 %v347_v29, 0.0  ;;  %v392_v2 = vmax.f32 %v391_v59, 0.0  ;;  %v3545_v3 = vld [vmem:[#allocation7 + $0x400] ss:$24 sps:$4 sm:$0xff]   ;;  %v3589_v29 = vld [vmem:[#allocation7 + $0x57c] ss:$24 sps:$4 sm:$0xff]  }
 0x25e   :  { %v315_v48 = vadd.f32 %v314_v38, %v310_v37  ;;  %v3584_v5 = vld [vmem:[#allocation7 + $0x570] ss:$24 sps:$4 sm:$0xff]   ;;  %v3590_v37 = vld [vmem:[#allocation7 + $0x5a0] ss:$24 sps:$4 sm:$0xff]   ;;  %v3604_v49 = vld [vmem:[#allocation7 + $0x494] ss:$24 sps:$4 sm:$0xff]  }
 0x25f   :  { %v349_v51 = vadd.f32 %v348_v28, %v344_v55  ;;  %v3593_v38 = vld [vmem:[#allocation7 + $0x5a8] ss:$24 sps:$4 sm:$0xff]   ;;  %v3601_v28 = vld [vmem:[#allocation7 + $0x5dc] ss:$24 sps:$4 sm:$0xff]  }
 0x260   :  { %v405_v60 = vadd.f32 %v4041_v31, %v315_v48  ;;  %v3551_v31 = vld [vmem:[#allocation7 + $0x460] ss:$24 sps:$4 sm:$0xff]   ;;  %v3596_v55 = vld [vmem:[#allocation7 + $0x5d0] ss:$24 sps:$4 sm:$0xff]  }
 0x261   :  { %v354_v61 = vadd.f32 %v353_v50, %v349_v51 }
 0x279   :  { %v1422_v35 = vpop.f32.mrb[16].mxu0 }
 0x27a   :  { %v1423_v4 = vadd.f32 %v3985_v8, %v1422_v35  ;;  %v3296_v9 = vpop.f32.mrb[17].mxu0 }
 0x27b   :  { %v1425_v10 = vpop.f32.mrb[18].mxu0  ;;  %v3553_v9 = vld [vmem:[#allocation7 + $0x464] ss:$24 sps:$4 sm:$0xff]  }
 0x27c   :  { %v1428_v12 = vmax.f32 %v1423_v4, 0.0  ;;  %v3297_v14 = vpop.f32.mrb[19].mxu0  ;;  %v3548_v4 = vld [vmem:[#allocation7 + $0x430] ss:$24 sps:$4 sm:$0xff]  }
 0x27d   :  { %v3559_v14 = vld [vmem:[#allocation7 + $0x48c] ss:$24 sps:$4 sm:$0xff]  }
 0x27e   :  { %v4079_v16 = vpack.c.bf16 %v1428_v12, %v1428_v12  ;;  %v3557_v12 = vld [vmem:[#allocation7 + $0x488] ss:$24 sps:$4 sm:$0xff]  }
 0x280   :  { %1751 = vmatmul.mubr.bf16.vlgmr.msra.gmra.mrb[16].mxu1 %v4079_v16  ;;  %1792 = vmatmul.mubr.bf16.vlgmr.msra.gmra.mrb[20].mxu0 %v4079_v16 }
 0x281   :  { %1801 = vmatpush1.bf16.msra.mxu1 %v3530_v53  ;;  %3299 = vmatpush3.bf16.msra.mxu0 %v4021_v1  ;;  %v381_v1 = vunpack.c.h.bf16 %v341_v15  ;;  %v3565_v53 = vld [vmem:[#allocation7 + $0x4bc] ss:$24 sps:$4 sm:$0xff]  }
 0x282   :  { %1802 = vmatprep.subr.bf16.mxu1 %v3535_v17  ;;  %3300 = vmatprep.subr.bf16.mxu0 %v3808_v0  ;;  %v3568_v15 = vld [vmem:[#allocation7 + $0x4e4] ss:$24 sps:$4 sm:$0xff]   ;;  %v3566_v17 = vld [vmem:[#allocation7 + $0x4e0] ss:$24 sps:$4 sm:$0xff]  }
 0x283   :  { %1832 = vmatprep.mubr.bf16.mxu1 %v3810_v6  ;;  %3314 = vmatprep.mubr.msk.bf16.mxu0 %vm3809_vm0, %v3808_v0  ;;  %v382_v44 = vmax.f32 %v381_v1, 0.0  ;;  %v3587_v1 = vld [vmem:[#allocation7 + $0x578] ss:$24 sps:$4 sm:$0xff]  }
 0x285   :  { %1803 = vmatpush1.bf16.msra.mxu1 %v3533_v21  ;;  %3301 = vmatpush3.bf16.msra.mxu0 %v4030_v13  ;;  %v3544_v13 = vld [vmem:[#allocation7 + $0x3d4] ss:$24 sps:$4 sm:$0xff]   ;;  %v383_v52 = vadd.f32 %v382_v44, %v3955_v27  ;;  %v3572_v21 = vld [vmem:[#allocation7 + $0x510] ss:$24 sps:$4 sm:$0xff]  }
 0x286   :  { %1804 = vmatprep.subr.bf16.mxu1 %v3538_v24  ;;  %3302 = vmatprep.subr.bf16.mxu0 %v3808_v0  ;;  %v3550_v27 = vld [vmem:[#allocation7 + $0x434] ss:$24 sps:$4 sm:$0xff]   ;;  %v3580_v24 = vld [vmem:[#allocation7 + $0x544] ss:$24 sps:$4 sm:$0xff]   ;;  %v3599_v44 = vld [vmem:[#allocation7 + $0x5d8] ss:$24 sps:$4 sm:$0xff]  }
 0x287   :  { %v388_v30 = vadd.f32 %v387_v54, %v383_v52 }
 0x289   :  { %1805 = vmatpush1.bf16.msra.mxu1 %v3536_v34  ;;  %3303 = vmatpush3.bf16.msra.mxu0 %v4036_v22  ;;  %v3547_v22 = vld [vmem:[#allocation7 + $0x404] ss:$24 sps:$4 sm:$0xff]   ;;  %v393_v35 = vadd.f32 %v392_v2, %v388_v30 }
 0x28a   :  { %1806 = vmatprep.subr.bf16.mxu1 %v3541_v36  ;;  %3304 = vmatprep.subr.bf16.mxu0 %v3808_v0  ;;  %v3592_v34 = vld [vmem:[#allocation7 + $0x5a4] ss:$24 sps:$4 sm:$0xff]  }
 0x28b   :  { %v3595_v36 = vld [vmem:[#allocation7 + $0x5ac] ss:$24 sps:$4 sm:$0xff]  }
 0x28d   :  { %1807 = vmatpush1.bf16.msra.mxu1 %v3539_v47  ;;  %3305 = vmatpush3.bf16.msra.mxu0 %v4043_v33  ;;  %v406_v33 = vadd.f32 %v405_v60, %v354_v61  ;;  %v3626_v47 = vld [vmem:[#allocation8 + $0x40] sm:$0xff]  }
 0x28e   :  { %1808 = vmatprep.subr.bf16.mxu1 %v3544_v13  ;;  %3306 = vmatprep.subr.bf16.mxu0 %v3808_v0 }
 0x28f   :  { %v407_v10 = vadd.f32 %v406_v33, %v393_v35 }
 0x291   :  { %1809 = vmatpush1.bf16.msra.mxu1 %v3542_v7  ;;  %3307 = vmatpush3.bf16.msra.mxu0 %v4048_v39  ;;  %v1847_v39 = vpack.c.bf16 %v407_v10, %v407_v10 }
 0x292   :  { %1810 = vmatprep.subr.bf16.mxu1 %v3547_v22  ;;  %3308 = vmatprep.subr.bf16.mxu0 %v3808_v0 }
 0x295   :  { %1811 = vmatpush1.bf16.msra.mxu1 %v3545_v3  ;;  %3309 = vmatpush3.bf16.msra.mxu0 %v4052_v41  ;;  %v3554_v41 = vld [vmem:[#allocation7 + $0x480] ss:$24 sps:$4 sm:$0xff]  }
 0x296   :  { %1812 = vmatprep.subr.bf16.mxu1 %v3550_v27  ;;  %3310 = vmatprep.subr.bf16.mxu0 %v3808_v0 }
 0x299   :  { %1813 = vmatpush1.bf16.msra.mxu1 %v3548_v4  ;;  %3311 = vmatpush3.bf16.msra.mxu0 %v4056_v43  ;;  %v3562_v43 = vld [vmem:[#allocation7 + $0x4b4] ss:$24 sps:$4 sm:$0xff]  }
 0x29a   :  { %1814 = vmatprep.subr.bf16.mxu1 %v3553_v9  ;;  %3312 = vmatprep.subr.bf16.mxu0 %v3808_v0  ;;  %v3560_v0 = vld [vmem:[#allocation7 + $0x4b0] ss:$24 sps:$4 sm:$0xff]  }
 0x29d   :  { %1815 = vmatpush1.bf16.msra.mxu1 %v3551_v31  ;;  %3313 = vmatpush3.bf16.msra.mxu0 %v4060_v45  ;;  %v3563_v45 = vld [vmem:[#allocation7 + $0x4b8] ss:$24 sps:$4 sm:$0xff]  }
 0x29e   :  { %2178 = vmatprep.subr.bf16.mxu1 %v3556_v11  ;;  %2219 = vmatprep.subr.bf16.mxu0 %v3559_v14  ;;  %v3602_v31 = vld [vmem:[#allocation7 + $0x490] ss:$24 sps:$4 sm:$0xff]   ;;  %v3627_v11 = vld [vmem:[#allocation8] sm:$0xff]  }
 0x29f   :  { %v3634_v14 = vld [vmem:[#allocation8 + $0x50] sm:$0xff]  }
 0x2a0   :  { %1833 = vmatmul.mubr.bf16.vlgmr.msra.gmra.mrb[20].mxu1 %v4079_v16  ;;  %3315 = vmatmul.mubr.bf16.vlgmr.msra.gmra.mrb[24].mxu0 %v1847_v39  ;;  %v3571_v16 = vld [vmem:[#allocation7 + $0x4ec] ss:$24 sps:$4 sm:$0xff]  }
 0x2a1   :  { %2210 = vmatprep.mubr.bf16.mxu1 %v3810_v6  ;;  %2251 = vmatprep.mubr.bf16.mxu0 %v3810_v6 }
 0x2a2   :  { %2179 = vmatpush1.bf16.msra.mxu1 %v3554_v41  ;;  %2220 = vmatpush1.bf16.msra.mxu0 %v3557_v12  ;;  %v3607_v41 = vld [vmem:[#allocation7 + $0x4c4] ss:$24 sps:$4 sm:$0xff]   ;;  %v3630_v12 = vld [vmem:[#allocation8 + $0x48] sm:$0xff]  }
 0x2a3   :  { %2180 = vmatprep.subr.bf16.mxu1 %v3562_v43  ;;  %2221 = vmatprep.subr.bf16.mxu0 %v3565_v53  ;;  %v3608_v43 = vld [vmem:[#allocation7 + $0x4f0] ss:$24 sps:$4 sm:$0xff]   ;;  %v3613_v53 = vld [vmem:[#allocation7 + $0x524] ss:$24 sps:$4 sm:$0xff]  }
 0x2a6   :  { %2181 = vmatpush1.bf16.msra.mxu1 %v3560_v0  ;;  %2222 = vmatpush1.bf16.msra.mxu0 %v3563_v45  ;;  %v3635_v0 = vld [vmem:[#allocation8 + $0x10] sm:$0xff]   ;;  %v3638_v45 = vld [vmem:[#allocation8 + $0x58] sm:$0xff]  }
 0x2a7   :  { %2182 = vmatprep.subr.bf16.mxu1 %v3568_v15  ;;  %2223 = vmatprep.subr.bf16.mxu0 %v3571_v16  ;;  %v3611_v15 = vld [vmem:[#allocation7 + $0x520] ss:$24 sps:$4 sm:$0xff]   ;;  %v3616_v16 = vld [vmem:[#allocation7 + $0x554] ss:$24 sps:$4 sm:$0xff]  }
 0x2aa   :  { %2183 = vmatpush1.bf16.msra.mxu1 %v3566_v17  ;;  %2224 = vmatpush1.bf16.msra.mxu0 %v3569_v18  ;;  %v3642_v17 = vld [vmem:[#allocation8 + $0x60] sm:$0xff]   ;;  %v3614_v18 = vld [vmem:[#allocation7 + $0x550] ss:$24 sps:$4 sm:$0xff]  }
 0x2ab   :  { %2184 = vmatprep.subr.bf16.mxu1 %v3574_v19  ;;  %2225 = vmatprep.subr.bf16.mxu0 %v3577_v20  ;;  %v3619_v19 = vld [vmem:[#allocation7 + $0x584] ss:$24 sps:$4 sm:$0xff]  }
 0x2ac   :  { %v3643_v20 = vld [vmem:[#allocation8 + $0x20] sm:$0xff]  }
 0x2ae   :  { %2185 = vmatpush1.bf16.msra.mxu1 %v3572_v21  ;;  %2226 = vmatpush1.bf16.msra.mxu0 %v3575_v32  ;;  %v3646_v21 = vld [vmem:[#allocation8 + $0x68] sm:$0xff]   ;;  %v3617_v32 = vld [vmem:[#allocation7 + $0x580] ss:$24 sps:$4 sm:$0xff]  }
 0x2af   :  { %2186 = vmatprep.subr.bf16.mxu1 %v3580_v24  ;;  %2227 = vmatprep.subr.bf16.mxu0 %v3583_v42  ;;  %v3622_v24 = vld [vmem:[#allocation7 + $0x5b4] ss:$24 sps:$4 sm:$0xff]  }
 0x2b0   :  { %v3647_v42 = vld [vmem:[#allocation8 + $0x28] sm:$0xff]  }
 0x2b2   :  { %2187 = vmatpush1.bf16.msra.mxu1 %v3578_v25  ;;  %2228 = vmatpush1.bf16.msra.mxu0 %v3581_v58  ;;  %v3620_v25 = vld [vmem:[#allocation7 + $0x5b0] ss:$24 sps:$4 sm:$0xff]   ;;  %v3625_v58 = vld [vmem:[#allocation7 + $0x5e4] ss:$24 sps:$4 sm:$0xff]  }
 0x2b3   :  { %2188 = vmatprep.subr.bf16.mxu1 %v3586_v26  ;;  %2229 = vmatprep.subr.bf16.mxu0 %v3589_v29  ;;  %v3623_v26 = vld [vmem:[#allocation7 + $0x5e0] ss:$24 sps:$4 sm:$0xff]  }
 0x2b4   :  { %v3628_v29 = vld [vmem:[#allocation8 + $0xc0] sm:$0xff]  }
 0x2b6   :  { %2189 = vmatpush1.bf16.msra.mxu1 %v3584_v5  ;;  %2230 = vmatpush1.bf16.msra.mxu0 %v3587_v1  ;;  %v3629_v5 = vld [vmem:[#allocation8 + $0x80] sm:$0xff]   ;;  %v3632_v1 = vld [vmem:[#allocation8 + $0xc8] sm:$0xff]  }
 0x2b7   :  { %2190 = vmatprep.subr.bf16.mxu1 %v3592_v34  ;;  %2231 = vmatprep.subr.bf16.mxu0 %v3595_v36  ;;  %v3633_v34 = vld [vmem:[#allocation8 + $0x88] sm:$0xff]   ;;  %v3636_v36 = vld [vmem:[#allocation8 + $0xd0] sm:$0xff]  }
 0x2ba   :  { %2191 = vmatpush1.bf16.msra.mxu1 %v3590_v37  ;;  %2232 = vmatpush1.bf16.msra.mxu0 %v3593_v38  ;;  %v3637_v37 = vld [vmem:[#allocation8 + $0x90] sm:$0xff]   ;;  %v3640_v38 = vld [vmem:[#allocation8 + $0xd8] sm:$0xff]  }
 0x2bb   :  { %2192 = vmatprep.subr.bf16.mxu1 %v3598_v23  ;;  %2233 = vmatprep.subr.bf16.mxu0 %v3601_v28  ;;  %v3641_v23 = vld [vmem:[#allocation8 + $0x98] sm:$0xff]   ;;  %v3645_v28 = vld [vmem:[#allocation8 + $0xa0] sm:$0xff]  }
 0x2be   :  { %2193 = vmatpush1.bf16.msra.mxu1 %v3596_v55  ;;  %2234 = vmatpush1.bf16.msra.mxu0 %v3599_v44  ;;  %v3644_v55 = vld [vmem:[#allocation8 + $0xe0] sm:$0xff]   ;;  %v3648_v44 = vld [vmem:[#allocation8 + $0xe8] sm:$0xff]  }
 0x2bf   :  { %2260 = vmatprep.subr.bf16.mxu1 %v3604_v49  ;;  %3172 = vmatprep.subr.bf16.mxu0 %v3626_v47  ;;  %v3649_v49 = vld [vmem:[#allocation8 + $0xa8] sm:$0xff]   ;;  %v3650_v47 = vld [vmem:[#allocation8 + $0x70] sm:$0xff]  }
 0x353   :  { %v1752_v13 = vpop.f32.mrb[16].mxu1  ;;  %v1793_v48 = vpop.f32.mrb[20].mxu0 }
 0x354   :  { %v4111_v50 = vadd.f32 %v1752_v13, %v4065_v40  ;;  %v4114_v51 = vadd.f32 %v1793_v48, %v4069_v56  ;;  %v1754_v52 = vpop.f32.mrb[17].mxu1  ;;  %v1795_v54 = vpop.f32.mrb[21].mxu0  ;;  %v3651_v13 = vld [vmem:[#allocation8 + $0x30] sm:$0xff]  }
 0x355   :  { %v4117_v59 = vadd.f32 %v1754_v52, %v4067_v46  ;;  %v4120_v7 = vadd.f32 %v1795_v54, %v4073_v62  ;;  %v1756_v22 = vpop.f32.mrb[18].mxu1  ;;  %v1797_v61 = vpop.f32.mrb[22].mxu0  ;;  %v3652_v48 = vld [vmem:[#allocation8 + $0xf0] sm:$0xff]   ;;  %v3654_v54 = vld [vmem:[#allocation8 + $0x78] sm:$0xff]  }
 0x356   :  { %v1757_v30 = vpop.f32.mrb[19].mxu1  ;;  %v1798_v2 = vpop.f32.mrb[23].mxu0  ;;  %v3653_v52 = vld [vmem:[#allocation8 + $0xb0] sm:$0xff]   ;;  %v3655_v22 = vld [vmem:[#allocation8 + $0x38] sm:$0xff]  }
 0x357   :  { %v3656_v61 = vld [vmem:[#allocation8 + $0xf8] sm:$0xff]   ;;  %v3658_v2 = vld [vmem:[#allocation8 + $0x140] sm:$0xff]  }
 0x358   :  { %v3657_v30 = vld [vmem:[#allocation8 + $0xb8] sm:$0xff]  }
 0x373   :  { %v1834_v60 = vpop.f32.mrb[20].mxu1  ;;  %v1882_v3 = vpop.f32.mrb[24].mxu0 }
 0x374   :  { %v4123_v40 = vadd.f32 %v1834_v60, %v4071_v57  ;;  %v1883_v56 = vadd.f32 %v3985_v8, %v1882_v3  ;;  %v1836_v27 = vpop.f32.mrb[21].mxu1  ;;  %v3316_v35 = vpop.f32.mrb[25].mxu0  ;;  %v3605_v57 = vld [vmem:[#allocation7 + $0x4c0] ss:$24 sps:$4 sm:$0xff]   ;;  %v3610_v8 = vld [vmem:[#allocation7 + $0x4f4] ss:$24 sps:$4 sm:$0xff]   ;;  %v2309_v60 = vlaneseq }
 0x375   :  { %v4127_v33 = vadd.f32 %v1836_v27, %v4075_v63  ;;  %v1838_v46 = vpop.f32.mrb[22].mxu1  ;;  %v1885_v4 = vpop.f32.mrb[26].mxu0  ;;  %v3631_v63 = vld [vmem:[#allocation8 + $0x8] sm:$0xff]   ;;  %v2307_v35 = vld [vmem:[%s4166_s4] sm:$0x3f] }
 0x376   :  { %v1888_v62 = vmax.f32 %v1883_v56, 0.0  ;;  %v1839_v9 = vpop.f32.mrb[23].mxu1  ;;  %v3317_v10 = vpop.f32.mrb[27].mxu0  ;;  %v4130_v3 = vshrl.u32 %v2309_v60, 7 }
 0x378   :  { %v1889_v39 = vpack.c.bf16 %v1888_v62, %v1888_v62  ;;  %v2311_v56 = vsub.s32 0, %v4130_v3  ;;  %v2319_v27 = vsub.s32 2, %v4130_v3  ;;  %v2315_v46 = vsub.s32 1, %v4130_v3 }
 0x379   :  { %v2323_v4 = vsub.s32 3, %v4130_v3 }
 0x37a   :  { %2211 = vmatmul.mubr.bf16.vlgmr.msra.gmra.mrb[24].mxu1 %v1889_v39  ;;  %2252 = vmatmul.mubr.bf16.vlgmr.msra.gmra.mrb[28].mxu0 %v1889_v39  ;;  %v2312_v62 = vrot.slane %v2307_v35, %v2311_v56  ;;  %v2320_v9 = vrot.slane %v2307_v35, %v2319_v27 }
 0x37b   :  { %2261 = vmatpush1.bf16.msra.mxu1 %v3602_v31  ;;  %2292 = vmatprep.mubr.bf16.mxu1 %v3810_v6  ;;  %v3639_v6 = vld [vmem:[#allocation8 + $0x18] sm:$0xff]  }
 0x37c   :  { %2262 = vmatprep.subr.bf16.mxu1 %v3607_v41  ;;  %3173 = vmatpush3.bf16.msra.mxu0 %v3627_v11  ;;  %v2324_v41 = vrot.slane %v2307_v35, %v2323_v4 }
 0x37d   :  { %3174 = vmatprep.subr.bf16.mxu0 %v3630_v12 }
 0x37f   :  { %2263 = vmatpush1.bf16.msra.mxu1 %v3605_v57 }
 0x380   :  { %2264 = vmatprep.subr.bf16.mxu1 %v3610_v8  ;;  %3175 = vmatpush3.bf16.msra.mxu0 %v3631_v63 }
 0x381   :  { %3176 = vmatprep.subr.bf16.mxu0 %v3634_v14 }
 0x383   :  { %2265 = vmatpush1.bf16.msra.mxu1 %v3608_v43 }
 0x384   :  { %2266 = vmatprep.subr.bf16.mxu1 %v3613_v53  ;;  %3177 = vmatpush3.bf16.msra.mxu0 %v3635_v0 }
 0x385   :  { %3178 = vmatprep.subr.bf16.mxu0 %v3638_v45 }
 0x387   :  { %2267 = vmatpush1.bf16.msra.mxu1 %v3611_v15 }
 0x388   :  { %2268 = vmatprep.subr.bf16.mxu1 %v3616_v16  ;;  %3179 = vmatpush3.bf16.msra.mxu0 %v3639_v6 }
 0x389   :  { %3180 = vmatprep.subr.bf16.mxu0 %v3642_v17 }
 0x38b   :  { %2269 = vmatpush1.bf16.msra.mxu1 %v3614_v18 }
 0x38c   :  { %2270 = vmatprep.subr.bf16.mxu1 %v3619_v19  ;;  %3181 = vmatpush3.bf16.msra.mxu0 %v3643_v20 }
 0x38d   :  { %3182 = vmatprep.subr.bf16.mxu0 %v3646_v21 }
 0x38f   :  { %2271 = vmatpush1.bf16.msra.mxu1 %v3617_v32  ;;  %v3659_v32 = vld [vmem:[#allocation8 + $0x100] sm:$0xff]  }
 0x390   :  { %2272 = vmatprep.subr.bf16.mxu1 %v3622_v24  ;;  %3183 = vmatpush3.bf16.msra.mxu0 %v3647_v42 }
 0x391   :  { %3184 = vmatprep.subr.bf16.mxu0 %v3650_v47 }
 0x393   :  { %2273 = vmatpush1.bf16.msra.mxu1 %v3620_v25  ;;  %v3662_v25 = vld [vmem:[#allocation8 + $0x150] sm:$0xff]  }
 0x394   :  { %2274 = vmatprep.subr.bf16.mxu1 %v3625_v58  ;;  %3185 = vmatpush3.bf16.msra.mxu0 %v3651_v13  ;;  %v3663_v58 = vld [vmem:[#allocation8 + $0x110] sm:$0xff]  }
 0x395   :  { %3186 = vmatprep.subr.bf16.mxu0 %v3654_v54 }
 0x397   :  { %2275 = vmatpush1.bf16.msra.mxu1 %v3623_v26  ;;  %v3664_v26 = vld [vmem:[#allocation8 + $0x158] sm:$0xff]  }
 0x398   :  { %3194 = vmatprep.subr.bf16.mxu1 %v3628_v29  ;;  %3187 = vmatpush3.bf16.msra.mxu0 %v3655_v22  ;;  %v3665_v29 = vld [vmem:[#allocation8 + $0x118] sm:$0xff]  }
 0x399   :  { %3216 = vmatprep.subr.bf16.mxu0 %v3658_v2  ;;  %v3673_v2 = vld [vmem:[#allocation8 + $0x138] sm:$0xff]  }
 0x39a   :  { %2293 = vmatmul.mubr.bf16.vlgmr.msra.gmra.mrb[28].mxu1 %v1889_v39  ;;  %v2316_v39 = vrot.slane %v2307_v35, %v2315_v46 }
 0x39b   :  { %3195 = vmatpush3.bf16.msra.mxu1 %v3629_v5  ;;  %v3666_v5 = vld [vmem:[#allocation8 + $0x160] sm:$0xff]  }
 0x39c   :  { %3196 = vmatprep.subr.bf16.mxu1 %v3632_v1  ;;  %v3667_v1 = vld [vmem:[#allocation8 + $0x120] sm:$0xff]  }
 0x39f   :  { %3197 = vmatpush3.bf16.msra.mxu1 %v3633_v34  ;;  %v3668_v34 = vld [vmem:[#allocation8 + $0x168] sm:$0xff]  }
 0x3a0   :  { %3198 = vmatprep.subr.bf16.mxu1 %v3636_v36  ;;  %v2327_v36 = vsub.s32 4, %v4130_v3 }
 0x3a3   :  { %3199 = vmatpush3.bf16.msra.mxu1 %v3637_v37  ;;  %v3669_v37 = vld [vmem:[#allocation8 + $0x128] sm:$0xff]  }
 0x3a4   :  { %3200 = vmatprep.subr.bf16.mxu1 %v3640_v38  ;;  %v2331_v38 = vsub.s32 5, %v4130_v3 }
 0x3a7   :  { %3201 = vmatpush3.bf16.msra.mxu1 %v3641_v23  ;;  %v3670_v23 = vld [vmem:[#allocation8 + $0x170] sm:$0xff]  }
 0x3a8   :  { %3202 = vmatprep.subr.bf16.mxu1 %v3644_v55  ;;  %v2328_v55 = vrot.slane %v2307_v35, %v2327_v36 }
 0x3ab   :  { %3203 = vmatpush3.bf16.msra.mxu1 %v3645_v28 }
 0x3ac   :  { %3204 = vmatprep.subr.bf16.mxu1 %v3648_v44  ;;  %v2332_v44 = vrot.slane %v2307_v35, %v2331_v38 }
 0x3af   :  { %3205 = vmatpush3.bf16.msra.mxu1 %v3649_v49  ;;  %v3671_v49 = vld [vmem:[#allocation8 + $0x130] sm:$0xff]  }
 0x3b0   :  { %3206 = vmatprep.subr.bf16.mxu1 %v3652_v48  ;;  %v3672_v48 = vld [vmem:[#allocation8 + $0x178] sm:$0xff]  }
 0x3b3   :  { %3207 = vmatpush3.bf16.msra.mxu1 %v3653_v52 }
 0x3b4   :  { %3208 = vmatprep.subr.bf16.mxu1 %v3656_v61 }
 0x3b7   :  { %3209 = vmatpush3.bf16.msra.mxu1 %v3657_v30 }
 0x44d   :  { %v2212_v10 = vpop.f32.mrb[24].mxu1  ;;  %v2253_v31 = vpop.f32.mrb[28].mxu0 }
 0x44e   :  { %v2301_v11 = vadd.f32 %v2212_v10, %v4111_v50  ;;  %v2303_v12 = vadd.f32 %v2253_v31, %v4114_v51  ;;  %v2214_v57 = vpop.f32.mrb[25].mxu1  ;;  %v2255_v8 = vpop.f32.mrb[29].mxu0 }
 0x44f   :  { %v2302_v63 = vadd.f32 %v2214_v57, %v4117_v59  ;;  %v2304_v14 = vadd.f32 %v2255_v8, %v4120_v7  ;;  %v2216_v43 = vpop.f32.mrb[26].mxu1  ;;  %v2257_v53 = vpop.f32.mrb[30].mxu0  ;;  %v3660_v59 = vld [vmem:[#allocation8 + $0x148] sm:$0xff]  }
 0x450   :  { %v2339_v0 = vadd.f32 %v2312_v62, %v2301_v11  ;;  %v2341_v45 = vadd.f32 %v2320_v9, %v2303_v12  ;;  %v2217_v15 = vpop.f32.mrb[27].mxu1  ;;  %v2258_v16 = vpop.f32.mrb[31].mxu0  ;;  %v3661_v7 = vld [vmem:[#allocation8 + $0x108] sm:$0xff]  }
 0x451   :  { %v2340_v6 = vadd.f32 %v2316_v39, %v2302_v63  ;;  %v2342_v17 = vadd.f32 %v2324_v41, %v2304_v14 }
 0x452   :  { %v2345_v18 = vmax.f32 %v2339_v0, 0.0  ;;  %v2347_v19 = vmax.f32 %v2341_v45, 0.0 }
 0x453   :  { %v2346_v20 = vmax.f32 %v2340_v6, 0.0  ;;  %v2348_v50 = vmax.f32 %v2342_v17, 0.0 }
 0x454   :  { %v2351_v24 = vpack.c.bf16 %v2345_v18, %v2345_v18  ;;  %v2353_v42 = vpack.c.bf16 %v2347_v19, %v2347_v19 }
 0x455   :  { %v2352_v21 = vpack.c.bf16 %v2346_v20, %v2346_v20  ;;  %v2354_v51 = vpack.c.bf16 %v2348_v50, %v2348_v50 }
 0x457   :  { %2780 = vmatprep.mubr.bf16.mxu0 %v2352_v21  ;;  %2820 = vmatprep.mubr.bf16.mxu1 %v2354_v51 }
 0x458   :  { %2781 = vmatmul.mubr.bf16.vlgmr.msra.gmra.mrb[32].mxu0 %v2351_v24  ;;  %2821 = vmatmul.mubr.bf16.vlgmr.msra.gmra.mrb[32].mxu1 %v2353_v42 }
 0x459   :  { %3217 = vmatpush3.bf16.msra.mxu0 %v3659_v32 }
 0x45a   :  { %3218 = vmatprep.subr.bf16.mxu0 %v3660_v59 }
 0x45d   :  { %3219 = vmatpush3.bf16.msra.mxu0 %v3661_v7 }
 0x45e   :  { %3220 = vmatprep.subr.bf16.mxu0 %v3662_v25 }
 0x461   :  { %3221 = vmatpush3.bf16.msra.mxu0 %v3663_v58 }
 0x462   :  { %3222 = vmatprep.subr.bf16.mxu0 %v3664_v26 }
 0x465   :  { %3223 = vmatpush3.bf16.msra.mxu0 %v3665_v29 }
 0x466   :  { %3224 = vmatprep.subr.bf16.mxu0 %v3666_v5 }
 0x469   :  { %3225 = vmatpush3.bf16.msra.mxu0 %v3667_v1 }
 0x46a   :  { %3226 = vmatprep.subr.bf16.mxu0 %v3668_v34 }
 0x46d   :  { %v2294_v28 = vpop.f32.mrb[28].mxu1  ;;  %3227 = vmatpush3.bf16.msra.mxu0 %v3669_v37 }
 0x46e   :  { %v2305_v47 = vadd.f32 %v2294_v28, %v4123_v40  ;;  %v2296_v13 = vpop.f32.mrb[29].mxu1  ;;  %3228 = vmatprep.subr.bf16.mxu0 %v3670_v23 }
 0x46f   :  { %v2306_v52 = vadd.f32 %v2296_v13, %v4127_v33  ;;  %v2298_v54 = vpop.f32.mrb[30].mxu1  ;;  %v3087_v33 = vld [vmem:[%s4168_s6] ss:$0 sm:$0xff]  ;;  %s3770_s6 = scalar_lea.vmem %s2876_s8, 128 }
 0x470   :  { %v2343_v22 = vadd.f32 %v2328_v55, %v2305_v47  ;;  %v2299_v61 = vpop.f32.mrb[31].mxu1  ;;  %p3771_p4 = scmp.ne.s32.totalorder %s2876_s8, %s3770_s6  ;;  %p3776_p6 = scmp.lt.s32.totalorder %s3770_s6, %s3770_s6 }
 0x471   :  { %v2344_v30 = vadd.f32 %v2332_v44, %v2306_v52  ;;  %3229 = vmatpush3.bf16.msra.mxu0 %v3671_v49 }
 0x472   :  { %v2349_v60 = vmax.f32 %v2343_v22, 0.0  ;;  %3230 = vmatprep.subr.bf16.mxu0 %v3672_v48  ;;  %p3777_p7 = por %p3776_p6, %p3775_p5 }
 0x473   :  { %v2350_v3 = vmax.f32 %v2344_v30, 0.0 }
 0x474   :  { %v2355_v27 = vpack.c.bf16 %v2349_v60, %v2349_v60  ;;  %p3778_p8 = pnand %p3777_p7, %p3771_p4 }
 0x475   :  { %v2356_v56 = vpack.c.bf16 %v2350_v3, %v2350_v3  ;;  %3231 = vmatpush3.bf16.msra.mxu0 %v3673_v2 }
 0x477   :  { %2860 = vmatprep.mubr.bf16.mxu0 %v2356_v56 }
 0x478   :  { %2861 = vmatmul.mubr.bf16.vlgmr.msra.gmra.mrb[36].mxu0 %v2355_v27 }
 0x52b   :  { %v3188_v40 = vpop.f32.mrb[32].mxu0  ;;  %v3210_v35 = vpop.f32.mrb[32].mxu1 }
 0x52c   :  { %v3189_v46 = vpop.f32.mrb[33].mxu0  ;;  %v3211_v4 = vpop.f32.mrb[33].mxu1 }
 0x52d   :  { %v3190_v62 = vadd.f32 %v3189_v46, %v3188_v40  ;;  %v3212_v9 = vadd.f32 %v3211_v4, %v3210_v35  ;;  %v3191_v10 = vpop.f32.mrb[34].mxu0  ;;  %v3213_v31 = vpop.f32.mrb[34].mxu1 }
 0x52e   :  { %v3192_v39 = vpop.f32.mrb[35].mxu0  ;;  %v3214_v41 = vpop.f32.mrb[35].mxu1 }
 0x52f   :  { %v2783_v11 = vadd.f32 %v3190_v62, %v3087_v33 }
 0x531   :  { %v2823_v12 = vadd.f32 %v3212_v9, %v2783_v11 }
 0x54b   :  { %v3232_v57 = vpop.f32.mrb[36].mxu0 }
 0x54c   :  { %v3233_v8 = vpop.f32.mrb[37].mxu0 }
 0x54d   :  { %v3234_v63 = vadd.f32 %v3233_v8, %v3232_v57  ;;  %v3235_v14 = vpop.f32.mrb[38].mxu0 }
 0x54e   :  { %v3236_v43 = vpop.f32.mrb[39].mxu0 }
 0x54f   :  { %v2863_v53 = vadd.f32 %v3234_v63, %v2823_v12 }
 0x551   :  { %2868 = vst [vmem:[#allocation10] sm:$0xff] %v2863_v53 }
 0x552   :  { %3781 = shalt.err (!%p3778_p8)
}
 0x553   :  { %s3782_s11 = scalar_lea.hbm %s4169_s7, 128 }
 0x554   :  { %p3783_p9 = scmp.ne.s32.totalorder %s4169_s7, %s3782_s11  ;;  %p3786_p10 = scmp.lt.u32.totalorder %s3782_s11, %s4169_s7 }
 0x556   :  { %p3788_p11 = pnand %p3786_p10, %p3783_p9 }
 0x558   :  { %3791 = shalt.err (!%p3788_p11)
}
 0x559   :  { %2878 = dma.vmem_to_hbm [thread:$0]  %s2876_s8, 128, %s4169_s7, [#allocation4]  }
 0x55a   :  { %3798 = dma.done.wait [#allocation4], 128  }
 0x55b   :  { %3799 = vsyncadd [#allocation4], 4294967168 }
 0x55c   :  { %2882 = vsyncpa [#allocation3], 1 }
 0x55d   :  { %2883 = vsyncpa [#allocation6], 1 }
 0x55e   :  { %2884 = vsyncpa [#allocation9], 1 }
 0x55f   :  { %2885 = vsyncpa [#allocation4], 1 }

</bundles_post_ra>
